<compile_context>
chip_gen: v7x
topology: tpu7x:2x2x1
jax: 0.10.0
libtpu: 0.0.40
codegen_flags: <defaults>
</compile_context>

<pallas_src>
import jax
import jax.numpy as jnp
from jax.experimental import pallas as pl
from jax.experimental.pallas import tpu as pltpu


def qnetwork_kernel(x_ref,
                    w1_ref, b1_ref,
                    w2_ref, b2_ref,
                    w3_ref, b3_ref,
                    w4_ref, b4_ref,
                    w5_ref, b5_ref,
                    o_ref):
    mxu = w1_ref.dtype                                            # bf16 MXU operands

    h = x_ref[...].astype(mxu)                                    # (tb, Sp)
    h = jnp.tanh(jnp.dot(h, w1_ref[...],
                         preferred_element_type=jnp.float32) + b1_ref[...]).astype(mxu)
    h = jnp.tanh(jnp.dot(h, w2_ref[...],
                         preferred_element_type=jnp.float32) + b2_ref[...]).astype(mxu)
    h = jnp.tanh(jnp.dot(h, w3_ref[...],
                         preferred_element_type=jnp.float32) + b3_ref[...]).astype(mxu)
    h = jnp.tanh(jnp.dot(h, w4_ref[...],
                         preferred_element_type=jnp.float32) + b4_ref[...]).astype(mxu)
    out = jnp.dot(h, w5_ref[...],
                  preferred_element_type=jnp.float32) + b5_ref[...]

    # Re-read the f32 x tile from VMEM for the final scaling instead of holding
    # it in vregs across the whole layer chain (keeps register pressure low).
    o_ref[...] = (out * (1.0 - x_ref[...])).astype(o_ref.dtype)


def _round_up(n, m):
    return ((n + m - 1) // m) * m


def qnetwork_forward(x, params, *, tile_b=256, mxu_dtype=jnp.bfloat16):
    """x: (B, state_size) f32; params: list of (W, b) with W=(in,out), b=(1,out)."""
    B, S = x.shape
    A = params[-1][0].shape[1]                                    # action_size
    n_layers = len(params)

    # Clamp the batch tile to the (sublane-padded) batch so tiny batches don't
    # force a huge zero-padded tile, then pad batch to a multiple of tile_b and
    # features to a multiple of 128 (lane-dense matmuls and output stores).
    tile_b = max(8, min(tile_b, _round_up(B, 8)))
    Bp = _round_up(B, tile_b)
    Sp = _round_up(S, 128)
    Ap = _round_up(A, 128)
    x_p = jnp.pad(x.astype(jnp.float32), ((0, Bp - B), (0, Sp - S)))

    flat_params = []
    in_specs = [pl.BlockSpec((tile_b, Sp), lambda i: (i, 0))]     # x: tiled over batch
    flops = 0
    transc = 0
    nbytes = x_p.size * 4 + Bp * Ap * 4
    for li, (w, b) in enumerate(params):
        din, dout = w.shape
        dinp, doutp = _round_up(din, 128), _round_up(dout, 128)
        w_p = jnp.pad(w, ((0, dinp - din), (0, doutp - dout))).astype(mxu_dtype)
        b_p = jnp.pad(b.reshape(1, -1), ((0, 0), (0, doutp - dout))).astype(jnp.float32)
        flat_params += [w_p, b_p]
        # Constant (0, 0) index_map: weights stay resident, no re-DMA per step.
        in_specs.append(pl.BlockSpec((dinp, doutp), lambda i: (0, 0)))
        in_specs.append(pl.BlockSpec((1, doutp), lambda i: (0, 0)))
        flops += 2 * Bp * dinp * doutp
        if li < n_layers - 1:
            transc += Bp * doutp                                   # tanh count
        nbytes += w_p.size * w_p.dtype.itemsize + b_p.size * 4

    out_spec = pl.BlockSpec((tile_b, Ap), lambda i: (i, 0))

    out_p = pl.pallas_call(
        qnetwork_kernel,
        out_shape=jax.ShapeDtypeStruct((Bp, Ap), jnp.float32),
        grid_spec=pltpu.PrefetchScalarGridSpec(
            num_scalar_prefetch=0,
            grid=(Bp // tile_b,),
            in_specs=in_specs,
            out_specs=out_spec,
        ),
        compiler_params=pltpu.CompilerParams(
            dimension_semantics=("parallel",)),
        cost_estimate=pl.CostEstimate(
            flops=int(flops + 3 * Bp * Ap),
            transcendentals=int(transc),
            bytes_accessed=int(nbytes)),
    )(x_p, *flat_params)

    return out_p[:B, :A]


def init_params(key, state_size, action_size):
    """Deterministic init. Weights as (in, out), biases as (1, out). Matches
    nn.Linear semantics (y = x @ W_pt.T + b) with W = W_pt.T."""
    dims = [
        (state_size, state_size * 8),
        (state_size * 8, state_size * 4),
        (state_size * 4, state_size * 2),
        (state_size * 2, state_size),
        (state_size, action_size),
    ]
    params = []
    for (din, dout) in dims:
        key, kw, kb = jax.random.split(key, 3)
        scale = 1.0 / jnp.sqrt(jnp.float32(din))
        w = jax.random.uniform(kw, (din, dout), jnp.float32, -scale, scale)
        b = jax.random.uniform(kb, (1, dout), jnp.float32, -scale, scale)
        params.append((w, b))
    return params


def qnetwork_ref(x, params, mxu_dtype=jnp.float32):
    """Pure-JAX reference. With mxu_dtype=bf16 it mimics the kernel's
    bf16-matmul / f32-accumulate numerics (tanh, bias, (1-x) in f32)."""
    h = x.astype(jnp.float32)
    for (w, b) in params[:-1]:
        z = jnp.dot(h.astype(mxu_dtype), w.astype(mxu_dtype),
                    preferred_element_type=jnp.float32) + b
        h = jnp.tanh(z)
    w5, b5 = params[-1]
    out = jnp.dot(h.astype(mxu_dtype), w5.astype(mxu_dtype),
                  preferred_element_type=jnp.float32) + b5
    return out * (1.0 - x)


if __name__ == "__main__":
    state_size = 16
    action_size = 16    # must equal state_size for the `* (1 - x)` broadcast
    batch = 512         # -> 2 parallel grid steps of 256 rows (uses both v7x TCs)

    key = jax.random.PRNGKey(0)
    key, kx = jax.random.split(key)
    x = jax.random.normal(kx, (batch, state_size), jnp.float32)

    params = init_params(key, state_size, action_size)

    out = qnetwork_forward(x, params, tile_b=256)
    out = jax.block_until_ready(out)

    # Compare against a reference using the same bf16-operand / f32-accumulate
    # matmul numerics as the kernel.
    ref = qnetwork_ref(x, params, mxu_dtype=jnp.bfloat16)

    assert out.shape == (batch, action_size)
    assert jnp.allclose(out, ref, atol=2e-3, rtol=2e-3)

    print("KERNEL_OK")
</pallas_src>

<mosaic_0001>
module attributes {stable_mosaic.version = 11 : i64} {
  func.func @qnetwork_kernel(%arg0: i32, %arg1: memref<256x128xf32, #tpu.memory_space<vmem>>, %arg2: memref<128x128xbf16, #tpu.memory_space<vmem>>, %arg3: memref<1x128xf32, #tpu.memory_space<vmem>>, %arg4: memref<128x128xbf16, #tpu.memory_space<vmem>>, %arg5: memref<1x128xf32, #tpu.memory_space<vmem>>, %arg6: memref<128x128xbf16, #tpu.memory_space<vmem>>, %arg7: memref<1x128xf32, #tpu.memory_space<vmem>>, %arg8: memref<128x128xbf16, #tpu.memory_space<vmem>>, %arg9: memref<1x128xf32, #tpu.memory_space<vmem>>, %arg10: memref<128x128xbf16, #tpu.memory_space<vmem>>, %arg11: memref<1x128xf32, #tpu.memory_space<vmem>>, %arg12: memref<256x128xf32, #tpu.memory_space<vmem>>) attributes {dimension_semantics = [#tpu.dimension_semantics<parallel>], iteration_bounds = array<i64: 2>, scalar_prefetch = 0 : i64, scratch_operands = 0 : i64, tpu.core_type = #tpu.core_type<tc>, window_params = [{transform_indices = @transform_0, window_bounds = array<i64: 256, 128>}, {pipeline_mode = #tpu.pipeline_mode<synchronous>, transform_indices = @transform_1, window_bounds = array<i64: 128, 128>}, {pipeline_mode = #tpu.pipeline_mode<synchronous>, transform_indices = @transform_2, window_bounds = array<i64: 1, 128>}, {pipeline_mode = #tpu.pipeline_mode<synchronous>, transform_indices = @transform_3, window_bounds = array<i64: 128, 128>}, {pipeline_mode = #tpu.pipeline_mode<synchronous>, transform_indices = @transform_4, window_bounds = array<i64: 1, 128>}, {pipeline_mode = #tpu.pipeline_mode<synchronous>, transform_indices = @transform_5, window_bounds = array<i64: 128, 128>}, {pipeline_mode = #tpu.pipeline_mode<synchronous>, transform_indices = @transform_6, window_bounds = array<i64: 1, 128>}, {pipeline_mode = #tpu.pipeline_mode<synchronous>, transform_indices = @transform_7, window_bounds = array<i64: 128, 128>}, {pipeline_mode = #tpu.pipeline_mode<synchronous>, transform_indices = @transform_8, window_bounds = array<i64: 1, 128>}, {pipeline_mode = #tpu.pipeline_mode<synchronous>, transform_indices = @transform_9, window_bounds = array<i64: 128, 128>}, {pipeline_mode = #tpu.pipeline_mode<synchronous>, transform_indices = @transform_10, window_bounds = array<i64: 1, 128>}, {transform_indices = @transform_11, window_bounds = array<i64: 256, 128>}]} {
    %c0 = arith.constant 0 : index
    %c0_0 = arith.constant 0 : index
    %0 = vector.load %arg1[%c0, %c0_0] : memref<256x128xf32, #tpu.memory_space<vmem>>, vector<256x128xf32>
    %1 = arith.truncf %0 : vector<256x128xf32> to vector<256x128xbf16>
    %c0_1 = arith.constant 0 : index
    %c0_2 = arith.constant 0 : index
    %2 = vector.load %arg2[%c0_1, %c0_2] : memref<128x128xbf16, #tpu.memory_space<vmem>>, vector<128x128xbf16>
    %cst = arith.constant dense<0.000000e+00> : vector<256x128xf32>
    %3 = tpu.matmul %1, %2, %cst {dimension_numbers = #tpu.dot_dimension_numbers<[1], [0], [0], [1], [0, 0, 1, 1], [], []>} : vector<256x128xbf16>, vector<128x128xbf16>, vector<256x128xf32> -> vector<256x128xf32>
    %c0_3 = arith.constant 0 : index
    %c0_4 = arith.constant 0 : index
    %4 = vector.load %arg3[%c0_3, %c0_4] : memref<1x128xf32, #tpu.memory_space<vmem>>, vector<1x128xf32>
    %5 = vector.broadcast %4 : vector<1x128xf32> to vector<256x128xf32>
    %6 = arith.addf %3, %5 : vector<256x128xf32>
    %7 = math.tanh %6 : vector<256x128xf32>
    %8 = arith.truncf %7 : vector<256x128xf32> to vector<256x128xbf16>
    %c0_5 = arith.constant 0 : index
    %c0_6 = arith.constant 0 : index
    %9 = vector.load %arg4[%c0_5, %c0_6] : memref<128x128xbf16, #tpu.memory_space<vmem>>, vector<128x128xbf16>
    %cst_7 = arith.constant dense<0.000000e+00> : vector<256x128xf32>
    %10 = tpu.matmul %8, %9, %cst_7 {dimension_numbers = #tpu.dot_dimension_numbers<[1], [0], [0], [1], [0, 0, 1, 1], [], []>} : vector<256x128xbf16>, vector<128x128xbf16>, vector<256x128xf32> -> vector<256x128xf32>
    %c0_8 = arith.constant 0 : index
    %c0_9 = arith.constant 0 : index
    %11 = vector.load %arg5[%c0_8, %c0_9] : memref<1x128xf32, #tpu.memory_space<vmem>>, vector<1x128xf32>
    %12 = vector.broadcast %11 : vector<1x128xf32> to vector<256x128xf32>
    %13 = arith.addf %10, %12 : vector<256x128xf32>
    %14 = math.tanh %13 : vector<256x128xf32>
    %15 = arith.truncf %14 : vector<256x128xf32> to vector<256x128xbf16>
    %c0_10 = arith.constant 0 : index
    %c0_11 = arith.constant 0 : index
    %16 = vector.load %arg6[%c0_10, %c0_11] : memref<128x128xbf16, #tpu.memory_space<vmem>>, vector<128x128xbf16>
    %cst_12 = arith.constant dense<0.000000e+00> : vector<256x128xf32>
    %17 = tpu.matmul %15, %16, %cst_12 {dimension_numbers = #tpu.dot_dimension_numbers<[1], [0], [0], [1], [0, 0, 1, 1], [], []>} : vector<256x128xbf16>, vector<128x128xbf16>, vector<256x128xf32> -> vector<256x128xf32>
    %c0_13 = arith.constant 0 : index
    %c0_14 = arith.constant 0 : index
    %18 = vector.load %arg7[%c0_13, %c0_14] : memref<1x128xf32, #tpu.memory_space<vmem>>, vector<1x128xf32>
    %19 = vector.broadcast %18 : vector<1x128xf32> to vector<256x128xf32>
    %20 = arith.addf %17, %19 : vector<256x128xf32>
    %21 = math.tanh %20 : vector<256x128xf32>
    %22 = arith.truncf %21 : vector<256x128xf32> to vector<256x128xbf16>
    %c0_15 = arith.constant 0 : index
    %c0_16 = arith.constant 0 : index
    %23 = vector.load %arg8[%c0_15, %c0_16] : memref<128x128xbf16, #tpu.memory_space<vmem>>, vector<128x128xbf16>
    %cst_17 = arith.constant dense<0.000000e+00> : vector<256x128xf32>
    %24 = tpu.matmul %22, %23, %cst_17 {dimension_numbers = #tpu.dot_dimension_numbers<[1], [0], [0], [1], [0, 0, 1, 1], [], []>} : vector<256x128xbf16>, vector<128x128xbf16>, vector<256x128xf32> -> vector<256x128xf32>
    %c0_18 = arith.constant 0 : index
    %c0_19 = arith.constant 0 : index
    %25 = vector.load %arg9[%c0_18, %c0_19] : memref<1x128xf32, #tpu.memory_space<vmem>>, vector<1x128xf32>
    %26 = vector.broadcast %25 : vector<1x128xf32> to vector<256x128xf32>
    %27 = arith.addf %24, %26 : vector<256x128xf32>
    %28 = math.tanh %27 : vector<256x128xf32>
    %29 = arith.truncf %28 : vector<256x128xf32> to vector<256x128xbf16>
    %c0_20 = arith.constant 0 : index
    %c0_21 = arith.constant 0 : index
    %30 = vector.load %arg10[%c0_20, %c0_21] : memref<128x128xbf16, #tpu.memory_space<vmem>>, vector<128x128xbf16>
    %cst_22 = arith.constant dense<0.000000e+00> : vector<256x128xf32>
    %31 = tpu.matmul %29, %30, %cst_22 {dimension_numbers = #tpu.dot_dimension_numbers<[1], [0], [0], [1], [0, 0, 1, 1], [], []>} : vector<256x128xbf16>, vector<128x128xbf16>, vector<256x128xf32> -> vector<256x128xf32>
    %c0_23 = arith.constant 0 : index
    %c0_24 = arith.constant 0 : index
    %32 = vector.load %arg11[%c0_23, %c0_24] : memref<1x128xf32, #tpu.memory_space<vmem>>, vector<1x128xf32>
    %33 = vector.broadcast %32 : vector<1x128xf32> to vector<256x128xf32>
    %34 = arith.addf %31, %33 : vector<256x128xf32>
    %c0_25 = arith.constant 0 : index
    %c0_26 = arith.constant 0 : index
    %35 = vector.load %arg1[%c0_25, %c0_26] : memref<256x128xf32, #tpu.memory_space<vmem>>, vector<256x128xf32>
    %cst_27 = arith.constant 1.000000e+00 : f32
    %36 = vector.broadcast %cst_27 : f32 to vector<256x128xf32>
    %37 = arith.subf %36, %35 : vector<256x128xf32>
    %38 = arith.mulf %34, %37 : vector<256x128xf32>
    %c0_28 = arith.constant 0 : index
    %c0_29 = arith.constant 0 : index
    %39 = vector.load %arg12[%c0_28, %c0_29] : memref<256x128xf32, #tpu.memory_space<vmem>>, vector<256x128xf32>
    tpu.vector_store %arg12[%c0_28, %c0_29], %38 {strides = array<i32>} : memref<256x128xf32, #tpu.memory_space<vmem>>, vector<256x128xf32>,
    return
  }
  func.func @transform_0(%arg0: i32) -> (i32, i32) {
    %c0_i32 = arith.constant 0 : i32
    %c0_i32_0 = arith.constant 0 : i32
    return %arg0, %c0_i32 : i32, i32
  }
  func.func @transform_1(%arg0: i32) -> (i32, i32) {
    %c0_i32 = arith.constant 0 : i32
    %c0_i32_0 = arith.constant 0 : i32
    %c0_i32_1 = arith.constant 0 : i32
    return %c0_i32, %c0_i32_0 : i32, i32
  }
  func.func @transform_2(%arg0: i32) -> (i32, i32) {
    %c0_i32 = arith.constant 0 : i32
    %c0_i32_0 = arith.constant 0 : i32
    %c0_i32_1 = arith.constant 0 : i32
    return %c0_i32, %c0_i32_0 : i32, i32
  }
  func.func @transform_3(%arg0: i32) -> (i32, i32) {
    %c0_i32 = arith.constant 0 : i32
    %c0_i32_0 = arith.constant 0 : i32
    %c0_i32_1 = arith.constant 0 : i32
    return %c0_i32, %c0_i32_0 : i32, i32
  }
  func.func @transform_4(%arg0: i32) -> (i32, i32) {
    %c0_i32 = arith.constant 0 : i32
    %c0_i32_0 = arith.constant 0 : i32
    %c0_i32_1 = arith.constant 0 : i32
    return %c0_i32, %c0_i32_0 : i32, i32
  }
  func.func @transform_5(%arg0: i32) -> (i32, i32) {
    %c0_i32 = arith.constant 0 : i32
    %c0_i32_0 = arith.constant 0 : i32
    %c0_i32_1 = arith.constant 0 : i32
    return %c0_i32, %c0_i32_0 : i32, i32
  }
  func.func @transform_6(%arg0: i32) -> (i32, i32) {
    %c0_i32 = arith.constant 0 : i32
    %c0_i32_0 = arith.constant 0 : i32
    %c0_i32_1 = arith.constant 0 : i32
    return %c0_i32, %c0_i32_0 : i32, i32
  }
  func.func @transform_7(%arg0: i32) -> (i32, i32) {
    %c0_i32 = arith.constant 0 : i32
    %c0_i32_0 = arith.constant 0 : i32
    %c0_i32_1 = arith.constant 0 : i32
    return %c0_i32, %c0_i32_0 : i32, i32
  }
  func.func @transform_8(%arg0: i32) -> (i32, i32) {
    %c0_i32 = arith.constant 0 : i32
    %c0_i32_0 = arith.constant 0 : i32
    %c0_i32_1 = arith.constant 0 : i32
    return %c0_i32, %c0_i32_0 : i32, i32
  }
  func.func @transform_9(%arg0: i32) -> (i32, i32) {
    %c0_i32 = arith.constant 0 : i32
    %c0_i32_0 = arith.constant 0 : i32
    %c0_i32_1 = arith.constant 0 : i32
    return %c0_i32, %c0_i32_0 : i32, i32
  }
  func.func @transform_10(%arg0: i32) -> (i32, i32) {
    %c0_i32 = arith.constant 0 : i32
    %c0_i32_0 = arith.constant 0 : i32
    %c0_i32_1 = arith.constant 0 : i32
    return %c0_i32, %c0_i32_0 : i32, i32
  }
  func.func @transform_11(%arg0: i32) -> (i32, i32) {
    %c0_i32 = arith.constant 0 : i32
    %c0_i32_0 = arith.constant 0 : i32
    return %arg0, %c0_i32 : i32, i32
  }
}

</mosaic_0001>

<bundles_post_ra>
// kernel: tpu_custom_call.1
= control target key start
LH: loop header
LB: loop body
LE: loop exit
PB: predicated region body
PF: predicated region fallthrough
CT: control target
= control target key end

     0   :  { %s3940_s0 = inlined_call_operand.hbm [shape: f32[512,128], index: 0, kind: input, shape index: {}]   ;;  %s3941_s1 = inlined_call_operand.hbm [shape: bf16[128,128], index: 1, kind: input, shape index: {}]   ;;  %s3942_s2 = inlined_call_operand.vmem [shape: f32[1,128], index: 2, kind: input, shape index: {}]   ;;  %s3943_s3 = inlined_call_operand.hbm [shape: bf16[128,128], index: 3, kind: input, shape index: {}]   ;;  %s3944_s4 = inlined_call_operand.vmem [shape: f32[1,128], index: 4, kind: input, shape index: {}]   ;;  %s3945_s5 = inlined_call_operand.hbm [shape: bf16[128,128], index: 5, kind: input, shape index: {}]   ;;  %s3946_s6 = inlined_call_operand.vmem [shape: f32[1,128], index: 6, kind: input, shape index: {}]   ;;  %s3947_s7 = inlined_call_operand.hbm [shape: bf16[128,128], index: 7, kind: input, shape index: {}]   ;;  %s3948_s8 = inlined_call_operand.vmem [shape: f32[1,128], index: 8, kind: input, shape index: {}]   ;;  %s3949_s9 = inlined_call_operand.hbm [shape: bf16[128,128], index: 9, kind: input, shape index: {}]   ;;  %s3950_s10 = inlined_call_operand.vmem [shape: f32[1,128], index: 10, kind: input, shape index: {}]   ;;  %s3951_s11 = inlined_call_operand.hbm [shape: f32[512,128], index: 11, kind: output, shape index: {}]  }
   0x1   :  { %3956 = sst [smem:[#allocation19_spill]] %s3941_s1 }
   0x2   :  { %3957 = sst [smem:[#allocation20_spill]] %s3948_s8 }
   0x3   :  { %3958 = sst [smem:[#allocation21_spill]] %s3950_s10 }
   0x4   :  { %3959 = sst [smem:[#allocation22_spill]] %s3951_s11 }
   0x5   :  { %16 = vsyncpa [#allocation3], 0 }
   0x6   :  { %18 = vsyncpa [#allocation3 + $0x1], 0 }
   0x7   :  { %19 = vsyncpa [#allocation6], 0 }
   0x8   :  { %20 = vsyncpa [#allocation9], 0 }
   0x9   :  { %21 = vsyncpa [#allocation12], 0 }
   0xa   :  { %22 = vsyncpa [#allocation4], 0 }
   0xb   :  { %24 = vsyncpa [#allocation4 + $0x1], 0  ;;  %s3313_s17 = smov 0   ;;  %s3315_s18 = smov 0  }
   0xc   :  { %s3317_s19 = smov 0   ;;  %s3319_s20 = smov 0  }
   0xd LB: > { %s3240_s21 = smov [#allocation5]   ;;  %s3334_s23 = sadd.s32 4294967295, %s3238_s20   ;;  %s3238_s20 = sphi %s3319_s20, %s3985_s20   ;;  %s3234_s19 = sphi %s3317_s19, %s3984_s19   ;;  %s3230_s18 = sphi %s3315_s18, %s3983_s18   ;;  %s3226_s17 = sphi %s3313_s17, %s3982_s17  }
   0xe   : > { %s309_s22 = sshll.u32 %s3240_s21, 4  ;;  %p2113_p0 = scmp.ge.s32.totalorder %s3238_s20, 1  ;;  %s3339_s22 = int_to_ptr.vmem [resolvable:$true] %s309_s22 }
   0xf   : > { %p3953_p1 = scmp.eq.s32.totalorder %s3334_s23, 0  ;;  %p297_p2 = scmp.lt.s32.totalorder %s3238_s20, 3 }
  0x10   : > { %s3241_s25 = smov [#allocation8]   ;;  %s3242_s28 = smov [#allocation7]  }
  0x11   : > { %p3341_p3 = pnand %p2113_p0, %p297_p2  ;;  %s341_s26 = sshll.u32 %s3241_s25, 4  ;;  %s3354_s26 = int_to_ptr.vmem [resolvable:$true] %s341_s26 }
  0x12   : > { %s325_s29 = sshll.u32 %s3242_s28, 4  ;;  %s3962_s1 = sld [smem:[#allocation19_spill]]  ;;  %s3356_s29 = int_to_ptr.vmem [resolvable:$true] %s325_s29 }
  0x13   : > { %s3960_s24 = scalar_select %p3341_p3, 1, 0 }
  0x14   : > { %p2583_p5 = pneg %p3341_p3 }
  0x16   : > { %p3350_p6 = pnand %p2583_p5, %p3953_p1 }
  0x18   : > { %s2990_s13 = scalar_lea.hbm %s3962_s1, 1024  ;;  %p3366_p8 = pneg %p3350_p6 }
  0x19   : > { %p2991_p7 = scmp.ne.s32.totalorder %s3962_s1, %s2990_s13  ;;  %p2997_p11 = scmp.lt.u32.totalorder %s2990_s13, %s3962_s1 }
  0x1b   : > { %p2993_p9 = pnand %p3366_p8, %p2991_p7 }
  0x1d   : > { %p2994_p10 = pneg %p2993_p9 }
  0x1f   : > { %p2999_p12 = pnand %p2997_p11, %p2994_p10 }
  0x21   : > { %3002 = shalt.err (!%p2999_p12)
}
  0x22   : > { %s3003_s28 = scalar_lea.vmem %s3339_s22, 1024  ;;  %p3011_p5 = scmp.lt.s32.totalorder %s3339_s22, %s3339_s22 }
  0x23   : > { %p3004_p13 = scmp.ne.s32.totalorder %s3339_s22, %s3003_s28  ;;  %p3012_p4 = scmp.lt.s32.totalorder %s3003_s28, %s3003_s28 }
  0x25   : > { %p3006_p0 = pnand %p3004_p13, %p3366_p8  ;;  %p3013_p7 = por %p3012_p4, %p3011_p5 }
  0x27   : > { %p3007_p2 = pneg %p3006_p0 }
  0x29   : > { %p3014_p9 = pnand %p3013_p7, %p3007_p2 }
  0x2b   : > { %3017 = shalt.err (!%p3014_p9)
}
  0x2c   : > { %s3243_s30 = smov 64   ;;  %s3244_s12 = smov 4  }
  0x2d   : > { %2586 = dma.hbm_to_vmem [thread:$0]  (!%p3350_p6), %s3962_s1, 1024, %s3339_s22, [#allocation6], %s3243_s30, %s3243_s30, %s3244_s12  }
  0x2e   : > { %s3018_s25 = scalar_lea.hbm %s3945_s5, 1024 }
  0x2f   : > { %p3019_p4 = scmp.ne.s32.totalorder %s3945_s5, %s3018_s25  ;;  %p3025_p12 = scmp.lt.u32.totalorder %s3018_s25, %s3945_s5 }
  0x31   : > { %p3021_p10 = pnand %p3019_p4, %p3366_p8 }
  0x33   : > { %p3022_p11 = pneg %p3021_p10 }
  0x35   : > { %p3027_p13 = pnand %p3025_p12, %p3022_p11 }
  0x37   : > { %3030 = shalt.err (!%p3027_p13)
}
  0x38   : > { %s3031_s22 = scalar_lea.vmem %s3354_s26, 1024  ;;  %p3039_p7 = scmp.lt.s32.totalorder %s3354_s26, %s3354_s26 }
  0x39   : > { %p3032_p0 = scmp.ne.s32.totalorder %s3354_s26, %s3031_s22  ;;  %p3040_p9 = scmp.lt.s32.totalorder %s3031_s22, %s3031_s22 }
  0x3b   : > { %p3034_p2 = pnand %p3032_p0, %p3366_p8  ;;  %p3041_p4 = por %p3040_p9, %p3039_p7 }
  0x3d   : > { %p3035_p5 = pneg %p3034_p2 }
  0x3f   : > { %p3042_p10 = pnand %p3041_p4, %p3035_p5 }
  0x41   : > { %3045 = shalt.err (!%p3042_p10)
}
  0x42   : > { %2592 = dma.hbm_to_vmem [thread:$0]  (!%p3350_p6), %s3945_s5, 1024, %s3354_s26, [#allocation9], %s3243_s30, %s3243_s30, %s3244_s12  }
  0x43   : > { %s3046_s14 = scalar_lea.hbm %s3943_s3, 1024 }
  0x44   : > { %p3047_p11 = scmp.ne.s32.totalorder %s3943_s3, %s3046_s14  ;;  %p3053_p0 = scmp.lt.u32.totalorder %s3046_s14, %s3943_s3 }
  0x46   : > { %p3049_p12 = pnand %p3047_p11, %p3366_p8 }
  0x48   : > { %p3050_p13 = pneg %p3049_p12 }
  0x4a   : > { %p3055_p2 = pnand %p3053_p0, %p3050_p13 }
  0x4c   : > { %3058 = shalt.err (!%p3055_p2)
}
  0x4d   : > { %s3059_s26 = scalar_lea.vmem %s3356_s29, 1024  ;;  %p3067_p4 = scmp.lt.s32.totalorder %s3356_s29, %s3356_s29 }
  0x4e   : > { %p3060_p5 = scmp.ne.s32.totalorder %s3356_s29, %s3059_s26  ;;  %p3068_p10 = scmp.lt.s32.totalorder %s3059_s26, %s3059_s26 }
  0x50   : > { %p3062_p7 = pnand %p3060_p5, %p3366_p8  ;;  %p3069_p11 = por %p3068_p10, %p3067_p4 }
  0x52   : > { %p3063_p9 = pneg %p3062_p7 }
  0x54   : > { %p3070_p12 = pnand %p3069_p11, %p3063_p9 }
  0x56   : > { %3073 = shalt.err (!%p3070_p12)
}
  0x57   : > { %2589 = dma.hbm_to_vmem [thread:$0]  (!%p3350_p6), %s3943_s3, 1024, %s3356_s29, [#allocation6], %s3243_s30, %s3243_s30, %s3244_s12  }
  0x58   : > { %s3245_s10 = smov [#allocation10]   ;;  %s3246_s13 = smov [#allocation11]  }
  0x59   : > { %s357_s11 = sshll.u32 %s3245_s10, 4  ;;  %s373_s14 = sshll.u32 %s3246_s13, 4  ;;  %s358_s11 = int_to_ptr.vmem [resolvable:$true] %s357_s11  ;;  %s374_s14 = int_to_ptr.vmem [resolvable:$true] %s373_s14 }
  0x5a   : > { %s3074_s25 = scalar_lea.hbm %s3947_s7, 1024 }
  0x5b   : > { %p3075_p13 = scmp.ne.s32.totalorder %s3947_s7, %s3074_s25  ;;  %p3081_p5 = scmp.lt.u32.totalorder %s3074_s25, %s3947_s7 }
  0x5d   : > { %p3077_p0 = pnand %p3075_p13, %p3366_p8 }
  0x5f   : > { %p3078_p2 = pneg %p3077_p0 }
  0x61   : > { %p3083_p7 = pnand %p3081_p5, %p3078_p2 }
  0x63   : > { %3086 = shalt.err (!%p3083_p7)
}
  0x64   : > { %s3087_s29 = scalar_lea.vmem %s358_s11, 1024  ;;  %p3095_p11 = scmp.lt.s32.totalorder %s358_s11, %s358_s11 }
  0x65   : > { %p3088_p9 = scmp.ne.s32.totalorder %s358_s11, %s3087_s29  ;;  %p3096_p12 = scmp.lt.s32.totalorder %s3087_s29, %s3087_s29 }
  0x67   : > { %p3090_p4 = pnand %p3088_p9, %p3366_p8  ;;  %p3097_p1 = por %p3096_p12, %p3095_p11 }
  0x69   : > { %p3091_p10 = pneg %p3090_p4 }
  0x6b   : > { %p3098_p3 = pnand %p3097_p1, %p3091_p10 }
  0x6d   : > { %3101 = shalt.err (!%p3098_p3)
}
  0x6e   : > { %2595 = dma.hbm_to_vmem [thread:$0]  (!%p3350_p6), %s3947_s7, 1024, %s358_s11, [#allocation9], %s3243_s30, %s3243_s30, %s3244_s12  }
  0x6f   : > { %s3102_s15 = scalar_lea.hbm %s3949_s9, 1024 }
  0x70   : > { %p3103_p1 = scmp.ne.s32.totalorder %s3949_s9, %s3102_s15  ;;  %p3109_p0 = scmp.lt.u32.totalorder %s3102_s15, %s3949_s9 }
  0x72   : > { %p3105_p3 = pnand %p3103_p1, %p3366_p8 }
  0x74   : > { %p3106_p13 = pneg %p3105_p3 }
  0x76   : > { %p3111_p2 = pnand %p3109_p0, %p3106_p13 }
  0x78   : > { %3114 = shalt.err (!%p3111_p2)
}
  0x79   : > { %s3115_s22 = scalar_lea.vmem %s374_s14, 1024  ;;  %p3123_p4 = scmp.lt.s32.totalorder %s374_s14, %s374_s14 }
  0x7a   : > { %p3116_p5 = scmp.ne.s32.totalorder %s374_s14, %s3115_s22  ;;  %p3124_p10 = scmp.lt.s32.totalorder %s3115_s22, %s3115_s22 }
  0x7c   : > { %p3118_p7 = pnand %p3116_p5, %p3366_p8  ;;  %p3125_p11 = por %p3124_p10, %p3123_p4 }
  0x7e   : > { %p3119_p9 = pneg %p3118_p7 }
  0x80   : > { %p3126_p12 = pnand %p3125_p11, %p3119_p9 }
  0x82   : > { %3129 = shalt.err (!%p3126_p12)
}
  0x83   : > { %2598 = dma.hbm_to_vmem [thread:$0]  (!%p3350_p6), %s3949_s9, 1024, %s374_s14, [#allocation12], %s3243_s30, %s3243_s30, %s3244_s12  }
  0x84   : > { %s2112_s27 = sadd.s32 4294967294, %s3238_s20   ;;  %s3486_s16 = sadd.s32 1, %s3238_s20  }
  0x85   : > { %s37_s1 = sadd.s32 1, %s3234_s19  ;;  %s34_s8 = ssub.s32 %s3238_s20, %s3486_s16 }
  0x86   : > { %p44_p8 = scmp.ne.s32.totalorder %s3234_s19, %s3230_s18  ;;  %p35_p1 = scmp.eq.s32.totalorder %s34_s8, 0 }
  0x87   : > { %p45_p3 = scmp.eq.s32.totalorder %s3238_s20, 0  ;;  %p50_p13 = scmp.ne.s32.totalorder %s3230_s18, %s3226_s17 }
  0x88   : > { %p284_p0 = scmp.eq.s32.totalorder %s3334_s23, 1  ;;  %p3964_p5 = scmp.eq.s32.totalorder %s3334_s23, 0 }
  0x89   : > { %s3498_s10 = scalar_select %p35_p1, %s3234_s19, %s37_s1  }
  0x8a   : > { %p46_p2 = por %p45_p3, %p44_p8  ;;  %p3502_p7 = por %p3964_p5, %p50_p13 }
  0x8b   : > { %p3506_p6 = por %p284_p0, %p44_p8  ;;  %p290_p9 = scmp.eq.s32.totalorder %s2112_s27, 1 }
  0x8c   : > { %p2612_p4 = scmp.lt.s32.totalorder %s3238_s20, 2  ;;  %s390_s12 = sand.u32 1, %s3234_s19  }
  0x8d   : > { %s3966_s30 = scalar_select %p3506_p6, 1, 0 }
  0x8e   : > { %p3512_p10 = por %p290_p9, %p50_p13  ;;  %s2120_s15 = sshll.u32 %s390_s12, 8 }
  0x8f   : > { %s2181_s21 = sshll.u32 %s3238_s20, 12  ;;  %s394_s22 = scalar_lea.vmem [#allocation2], %s2120_s15 }
  0x90   : > { %s3967_s14 = scalar_select %p3512_p10, 1, 0 }
  0x91   : > { %s3520_s26 = scalar_lea.hbm %s3940_s0, %s2181_s21  ;;  %s401_s11 = sshll.u32 %s394_s22, 4  ;;  %s3526_s11 = int_to_ptr.vmem [resolvable:$true] %s401_s11 }
  0x92   : > { %p3522_p11 = pnand %p2612_p4, %p46_p2  ;;  %s3528_s27 = scalar_lea.sflag [#allocation3], %s390_s12 }
  0x93   : > { %s3130_s1 = scalar_lea.hbm %s3520_s26, 4096  ;;  %s3135_s21 = scalar_lea.hbm %s3940_s0, 8192 }
  0x94   : > { %p3131_p12 = scmp.ne.s32.totalorder %s3520_s26, %s3130_s1  ;;  %p3132_p8 = pneg %p3522_p11 }
  0x95   : > { %p3136_p13 = scmp.lt.u32.totalorder %s3520_s26, %s3940_s0  ;;  %p3137_p0 = scmp.lt.u32.totalorder %s3135_s21, %s3130_s1 }
  0x96   : > { %p3133_p1 = pnand %p3132_p8, %p3131_p12  ;;  %p3139_p5 = scmp.lt.u32.totalorder %s3130_s1, %s3520_s26 }
  0x97   : > { %p3138_p2 = por %p3137_p0, %p3136_p13 }
  0x98   : > { %p3134_p3 = pneg %p3133_p1 }
  0x99   : > { %p3140_p9 = por %p3139_p5, %p3138_p2 }
  0x9b   : > { %p3141_p4 = pnand %p3140_p9, %p3134_p3 }
  0x9d   : > { %3144 = shalt.err (!%p3141_p4)
}
  0x9e   : > { %s3145_s12 = scalar_lea.vmem %s3526_s11, 4096  ;;  %s3247_s22 = smov [#allocation2]  }
  0x9f   : > { %p3146_p12 = scmp.ne.s32.totalorder %s3526_s11, %s3145_s12  ;;  %s3150_s8 = sshll.u32 %s3247_s22, 4  ;;  %s3151_s8 = int_to_ptr.vmem [resolvable:$false] %s3150_s8 }
  0xa0   : > { %s3152_s15 = scalar_lea.vmem %s3151_s8, 8192  ;;  %p3153_p6 = scmp.lt.s32.totalorder %s3526_s11, %s3151_s8 }
  0xa1   : > { %p3148_p1 = pnand %p3146_p12, %p3132_p8  ;;  %p3154_p13 = scmp.lt.s32.totalorder %s3152_s15, %s3145_s12 }
  0xa3   : > { %p3149_p10 = pneg %p3148_p1  ;;  %p3155_p0 = por %p3154_p13, %p3153_p6 }
  0xa5   : > { %p3156_p2 = pnand %p3155_p0, %p3149_p10 }
  0xa7   : > { %3159 = shalt.err (!%p3156_p2)
}
  0xa8   : > { %s3248_s1 = smov 128   ;;  %s3249_s21 = smov 8  }
  0xa9   : > { %2602 = dma.hbm_to_vmem [thread:$0]  (!%p3522_p11), %s3520_s26, 4096, %s3526_s11, %s3528_s27, %s3248_s1, %s3248_s1, %s3249_s21  }
  0xaa   : > { %p3969_p8 = scmp.ne.s32.totalorder %s3960_s24, 0 }
  0xab   : > { %s3559_s25 = sand.u32 (!%p3969_p8), 1, %s3230_s18  }
  0xac   : > { %413 = sbr.rel (%p3969_p8) target bundleno = 1439 (0x59f), region = 64  ;;  %s2124_s28 = sshll.u32 (!%p3969_p8), %s3559_s25, 8 }
  0xad   : > { %s416_s12 = scalar_lea.sflag (!%p3969_p8), [#allocation3], %s3559_s25  ;;  %s3565_s22 = scalar_lea.vmem (!%p3969_p8), [#allocation2], %s2124_s28 }
  0xb3   : > { %3205 = dma.done.wait (%p3502_p7), %s416_s12, 4096  }
  0xb4   : > { %3207 = vsyncadd (%p3502_p7), %s416_s12, 4294963200  ;;  %p3970_p6 = scmp.eq.s32.totalorder %s3334_s23, 0 }
  0xb6   : > { %3209 = dma.done.wait (%p3970_p6), [#allocation6], 2048   ;;  %p3971_p10 = pmov %p3970_p6 }
  0xb7   : > { %p3972_p11 = pmov %p3970_p6 }
  0xb8   : > { %3211 = vsyncadd (%p3971_p10), [#allocation6], 4294965248 }
  0xb9   : > { %3213 = dma.done.wait (%p3972_p11), [#allocation9], 2048   ;;  %p3973_p3 = pmov %p3970_p6 }
  0xbb   : > { %3215 = vsyncadd (%p3973_p3), [#allocation9], 4294965248  ;;  %p3974_p5 = pmov %p3973_p3 }
  0xbc   : > { %p3975_p9 = pmov %p3973_p3 }
  0xbd   : > { %3217 = dma.done.wait (%p3974_p5), [#allocation12], 1024  }
  0xbe   : > { %3219 = vsyncadd (%p3975_p9), [#allocation12], 4294966272  ;;  %v2662_v0 = vld [vmem:[#allocation5] sm:$0xff]   ;;  %v2663_v1 = vld [vmem:[#allocation5 + $0x8] sm:$0xff]   ;;  %s3976_s1 = sld [smem:[#allocation20_spill]]  ;;  %s3977_s24 = sld [smem:[#allocation21_spill]] }
  0xbf   : > { %2303 = vmatprep.subr.bf16.mxu0 %v2662_v0  ;;  %2543 = vmatprep.subr.bf16.mxu1 %v2662_v0  ;;  %v2664_v2 = vld [vmem:[#allocation5 + $0x10] sm:$0xff]   ;;  %v2665_v3 = vld [vmem:[#allocation5 + $0x18] sm:$0xff]   ;;  %v481_v4 = vld [vmem:[%s3565_s22] sm:$0xff]  ;;  %s3799_s13 = scalar_lea.vmem [#allocation13], %s2124_s28  ;;  %s2182_s28 = sshll.u32 %s3334_s23, 12 }
  0xc0   : > { %2304 = vmatpush3.bf16.msra.mxu0 %v2662_v0  ;;  %2551 = vmatpush3.bf16.msra.mxu1 %v2662_v0  ;;  %v482_v5 = vld [vmem:[%s3565_s22 + $0x8] sm:$0xff]  ;;  %v2666_v7 = vld [vmem:[#allocation5 + $0x20] sm:$0xff]   ;;  %v2668_v12 = vld [vmem:[#allocation5 + $0x30] sm:$0xff]   ;;  %s1991_s26 = sshll.u32 %s3799_s13, 4  ;;  %s3978_s27 = sld [smem:[#allocation22_spill]]  ;;  %s3893_s26 = int_to_ptr.vmem [resolvable:$true] %s1991_s26 }
  0xc1   : > { %2305 = vmatprep.subr.bf16.mxu0 %v2663_v1  ;;  %2544 = vmatprep.subr.bf16.mxu1 %v2663_v1  ;;  %v513_v6 = vpack.c.bf16 %v482_v5, %v481_v4  ;;  %v497_v8 = vld [vmem:[%s3565_s22 + $0x80] sm:$0xff]  ;;  %v498_v9 = vld [vmem:[%s3565_s22 + $0x88] sm:$0xff]  ;;  %v2669_v13 = vld [vmem:[#allocation5 + $0x38] sm:$0xff]   ;;  %s1978_s23 = scalar_lea.sflag [#allocation4], %s3559_s25  ;;  %p3979_p4 = scmp.ne.s32.totalorder %s3966_s30, 0 }
  0xc2   : > { %v521_v10 = vpack.c.bf16 %v498_v9, %v497_v8  ;;  %v2667_v11 = vld [vmem:[#allocation5 + $0x28] sm:$0xff]   ;;  %v483_v14 = vld [vmem:[%s3565_s22 + $0x10] sm:$0xff]  ;;  %v484_v15 = vld [vmem:[%s3565_s22 + $0x18] sm:$0xff]  ;;  %s3250_s15 = smov [#allocation13]  }
  0xc3   : > { %2319 = vmatprep.mubr.bf16.mxu0 %v513_v6  ;;  %v485_v16 = vld [vmem:[%s3565_s22 + $0x20] sm:$0xff]  ;;  %v486_v17 = vld [vmem:[%s3565_s22 + $0x28] sm:$0xff]  ;;  %v499_v18 = vld [vmem:[%s3565_s22 + $0x90] sm:$0xff]  ;;  %v514_v23 = vpack.c.bf16 %v484_v15, %v483_v14 }
  0xc4   : > { %2306 = vmatpush3.bf16.msra.mxu0 %v2663_v1  ;;  %2552 = vmatpush3.bf16.msra.mxu1 %v2663_v1  ;;  %v500_v19 = vld [vmem:[%s3565_s22 + $0x98] sm:$0xff]  ;;  %v501_v20 = vld [vmem:[%s3565_s22 + $0xa0] sm:$0xff]  ;;  %v502_v21 = vld [vmem:[%s3565_s22 + $0xa8] sm:$0xff]  ;;  %v515_v24 = vpack.c.bf16 %v486_v17, %v485_v16 }
  0xc5   : > { %2307 = vmatprep.subr.bf16.mxu0 %v2664_v2  ;;  %2545 = vmatprep.subr.bf16.mxu1 %v2664_v2  ;;  %v2670_v22 = vld [vmem:[#allocation7] sm:$0xff]   ;;  %v522_v25 = vpack.c.bf16 %v500_v19, %v499_v18  ;;  %v2671_v26 = vld [vmem:[#allocation7 + $0x8] sm:$0xff]   ;;  %v523_v27 = vpack.c.bf16 %v502_v21, %v501_v20  ;;  %v487_v28 = vld [vmem:[%s3565_s22 + $0x30] sm:$0xff] }
  0xc6   : > { %2335 = vmatprep.mubr.bf16.mxu1 %v521_v10  ;;  %v488_v29 = vld [vmem:[%s3565_s22 + $0x38] sm:$0xff]  ;;  %v489_v30 = vld [vmem:[%s3565_s22 + $0x40] sm:$0xff]  ;;  %v490_v31 = vld [vmem:[%s3565_s22 + $0x48] sm:$0xff]  ;;  %s3891_s8 = scalar_lea.hbm %s3978_s27, %s2182_s28 }
  0xc7   : > { %v503_v32 = vld [vmem:[%s3565_s22 + $0xb0] sm:$0xff]  ;;  %v504_v33 = vld [vmem:[%s3565_s22 + $0xb8] sm:$0xff]  ;;  %v505_v34 = vld [vmem:[%s3565_s22 + $0xc0] sm:$0xff]  ;;  %v516_v37 = vpack.c.bf16 %v488_v29, %v487_v28  ;;  %v517_v38 = vpack.c.bf16 %v490_v31, %v489_v30 }
  0xc8   : > { %2308 = vmatpush3.bf16.msra.mxu0 %v2664_v2  ;;  %2553 = vmatpush3.bf16.msra.mxu1 %v2664_v2  ;;  %v506_v35 = vld [vmem:[%s3565_s22 + $0xc8] sm:$0xff]  ;;  %v2672_v36 = vld [vmem:[#allocation7 + $0x10] sm:$0xff]   ;;  %v524_v39 = vpack.c.bf16 %v504_v33, %v503_v32  ;;  %v2673_v41 = vld [vmem:[#allocation7 + $0x18] sm:$0xff]  }
  0xc9   : > { %2309 = vmatprep.subr.bf16.mxu0 %v2665_v3  ;;  %2546 = vmatprep.subr.bf16.mxu1 %v2665_v3  ;;  %v525_v40 = vpack.c.bf16 %v506_v35, %v505_v34  ;;  %v491_v42 = vld [vmem:[%s3565_s22 + $0x50] sm:$0xff]  ;;  %v492_v43 = vld [vmem:[%s3565_s22 + $0x58] sm:$0xff]  ;;  %v493_v44 = vld [vmem:[%s3565_s22 + $0x60] sm:$0xff] }
  0xca   : > { %v494_v45 = vld [vmem:[%s3565_s22 + $0x68] sm:$0xff]  ;;  %v507_v46 = vld [vmem:[%s3565_s22 + $0xd0] sm:$0xff]  ;;  %v508_v47 = vld [vmem:[%s3565_s22 + $0xd8] sm:$0xff]  ;;  %v518_v50 = vpack.c.bf16 %v492_v43, %v491_v42 }
  0xcb   : > { %v509_v48 = vld [vmem:[%s3565_s22 + $0xe0] sm:$0xff]  ;;  %v510_v49 = vld [vmem:[%s3565_s22 + $0xe8] sm:$0xff]  ;;  %v519_v51 = vpack.c.bf16 %v494_v45, %v493_v44  ;;  %v526_v52 = vpack.c.bf16 %v508_v47, %v507_v46  ;;  %v495_v54 = vld [vmem:[%s3565_s22 + $0x70] sm:$0xff] }
  0xcc   : > { %2310 = vmatpush3.bf16.msra.mxu0 %v2665_v3  ;;  %2554 = vmatpush3.bf16.msra.mxu1 %v2665_v3  ;;  %v527_v53 = vpack.c.bf16 %v510_v49, %v509_v48  ;;  %v496_v55 = vld [vmem:[%s3565_s22 + $0x78] sm:$0xff]  ;;  %v511_v56 = vld [vmem:[%s3565_s22 + $0xf0] sm:$0xff]  ;;  %v2674_v60 = vld [vmem:[#allocation7 + $0x20] sm:$0xff]  }
  0xcd   : > { %2311 = vmatprep.subr.bf16.mxu0 %v2666_v7  ;;  %2547 = vmatprep.subr.bf16.mxu1 %v2666_v7  ;;  %v512_v57 = vld [vmem:[%s3565_s22 + $0xf8] sm:$0xff]  ;;  %v520_v58 = vpack.c.bf16 %v496_v55, %v495_v54  ;;  %v2675_v61 = vld [vmem:[#allocation7 + $0x28] sm:$0xff]   ;;  %v2676_v62 = vld [vmem:[#allocation7 + $0x30] sm:$0xff]  }
  0xce   : > { %v528_v59 = vpack.c.bf16 %v512_v57, %v511_v56  ;;  %v2677_v63 = vld [vmem:[#allocation7 + $0x38] sm:$0xff]   ;;  %v2678_v0 = vld [vmem:[#allocation8] sm:$0xff]   ;;  %v2679_v1 = vld [vmem:[#allocation8 + $0x8] sm:$0xff]  }
  0xcf   : > { %v2680_v2 = vld [vmem:[#allocation8 + $0x10] sm:$0xff]   ;;  %v2681_v3 = vld [vmem:[#allocation8 + $0x18] sm:$0xff]   ;;  %v3618_v4 = vld [vmem:[%s3942_s2] ss:$0 sm:$0xff] }
  0xd0   : > { %2312 = vmatpush3.bf16.msra.mxu0 %v2666_v7  ;;  %2555 = vmatpush3.bf16.msra.mxu1 %v2666_v7 }
  0xd1   : > { %2313 = vmatprep.subr.bf16.mxu0 %v2667_v11  ;;  %2548 = vmatprep.subr.bf16.mxu1 %v2667_v11 }
  0xd4   : > { %2314 = vmatpush3.bf16.msra.mxu0 %v2667_v11  ;;  %2556 = vmatpush3.bf16.msra.mxu1 %v2667_v11 }
  0xd5   : > { %2315 = vmatprep.subr.bf16.mxu0 %v2668_v12  ;;  %2549 = vmatprep.subr.bf16.mxu1 %v2668_v12 }
  0xd8   : > { %2316 = vmatpush3.bf16.msra.mxu0 %v2668_v12  ;;  %2557 = vmatpush3.bf16.msra.mxu1 %v2668_v12 }
  0xd9   : > { %2317 = vmatprep.subr.bf16.mxu0 %v2669_v13  ;;  %2550 = vmatprep.subr.bf16.mxu1 %v2669_v13 }
  0xdc   : > { %2318 = vmatpush3.bf16.msra.mxu0 %v2669_v13  ;;  %2558 = vmatpush3.bf16.msra.mxu1 %v2669_v13 }
  0xdd   : > { %2351 = vmatprep.subr.bf16.mxu1 %v2670_v22  ;;  %2399 = vmatprep.subr.bf16.mxu0 %v2678_v0 }
  0xdf   : > { %2320 = vmatmul.mubr.bf16.vlgmr.msra.gmra.mrb[0].mxu0 %v514_v23  ;;  %2336 = vmatmul.mubr.bf16.vlgmr.msra.gmra.mrb[0].mxu1 %v522_v25 }
  0xe0   : > { %2323 = vmatprep.mubr.bf16.mxu0 %v515_v24  ;;  %2339 = vmatprep.mubr.bf16.mxu1 %v523_v27 }
  0xe1   : > { %2352 = vmatpush3.bf16.msra.mxu1 %v2670_v22  ;;  %2400 = vmatpush3.bf16.msra.mxu0 %v2678_v0 }
  0xe2   : > { %2353 = vmatprep.subr.bf16.mxu1 %v2671_v26  ;;  %2401 = vmatprep.subr.bf16.mxu0 %v2679_v1 }
  0xe5   : > { %2354 = vmatpush3.bf16.msra.mxu1 %v2671_v26  ;;  %2402 = vmatpush3.bf16.msra.mxu0 %v2679_v1 }
  0xe6   : > { %2355 = vmatprep.subr.bf16.mxu1 %v2672_v36  ;;  %2403 = vmatprep.subr.bf16.mxu0 %v2680_v2 }
  0xe7   : > { %2324 = vmatmul.mubr.bf16.gmra.mrb[4].mxu0 %v516_v37  ;;  %2340 = vmatmul.mubr.bf16.gmra.mrb[4].mxu1 %v524_v39 }
  0xe8   : > { %2327 = vmatprep.mubr.bf16.mxu0 %v517_v38  ;;  %2343 = vmatprep.mubr.bf16.mxu1 %v525_v40 }
  0xe9   : > { %2356 = vmatpush3.bf16.msra.mxu1 %v2672_v36  ;;  %2404 = vmatpush3.bf16.msra.mxu0 %v2680_v2 }
  0xea   : > { %2357 = vmatprep.subr.bf16.mxu1 %v2673_v41  ;;  %2405 = vmatprep.subr.bf16.mxu0 %v2681_v3 }
  0xed   : > { %2358 = vmatpush3.bf16.msra.mxu1 %v2673_v41  ;;  %2406 = vmatpush3.bf16.msra.mxu0 %v2681_v3 }
  0xee   : > { %2359 = vmatprep.subr.bf16.mxu1 %v2674_v60 }
  0xef   : > { %2328 = vmatmul.mubr.bf16.gmra.mrb[8].mxu0 %v518_v50  ;;  %2344 = vmatmul.mubr.bf16.gmra.mrb[8].mxu1 %v526_v52 }
  0xf0   : > { %2331 = vmatprep.mubr.bf16.mxu0 %v519_v51  ;;  %2347 = vmatprep.mubr.bf16.mxu1 %v527_v53 }
  0xf1   : > { %2360 = vmatpush3.bf16.msra.mxu1 %v2674_v60 }
  0xf2   : > { %2361 = vmatprep.subr.bf16.mxu1 %v2675_v61 }
  0xf5   : > { %2362 = vmatpush3.bf16.msra.mxu1 %v2675_v61 }
  0xf6   : > { %2363 = vmatprep.subr.bf16.mxu1 %v2676_v62 }
  0xf7   : > { %2332 = vmatmul.mubr.bf16.gmra.mrb[12].mxu0 %v520_v58  ;;  %2348 = vmatmul.mubr.bf16.gmra.mrb[12].mxu1 %v528_v59 }
  0xf9   : > { %2364 = vmatpush3.bf16.msra.mxu1 %v2676_v62 }
  0xfa   : > { %2365 = vmatprep.subr.bf16.mxu1 %v2677_v63 }
  0xfd   : > { %2366 = vmatpush3.bf16.msra.mxu1 %v2677_v63 }
 0x1b2   : > { %v2321_v5 = vpop.f32.mrb[0].mxu0  ;;  %v2337_v8 = vpop.f32.mrb[0].mxu1 }
 0x1b3   : > { %v643_v6 = vadd.f32 %v2321_v5, %v3618_v4  ;;  %v634_v7 = vpop.f32.mrb[1].mxu0  ;;  %v698_v11 = vpop.f32.mrb[1].mxu1  ;;  %v707_v14 = vadd.f32 %v2337_v8, %v3618_v4 }
 0x1b4   : > { %v635_v9 = vadd.f32 %v3618_v4, %v634_v7  ;;  %v2322_v10 = vpop.f32.mrb[2].mxu0  ;;  %v2338_v15 = vpop.f32.mrb[2].mxu1  ;;  %v699_v17 = vadd.f32 %v3618_v4, %v698_v11 }
 0x1b5   : > { %2702 = vtanh.f32 %v643_v6  ;;  %v646_v12 = vadd.f32 %v2322_v10, %v3618_v4  ;;  %v637_v13 = vpop.f32.mrb[3].mxu0  ;;  %v701_v18 = vpop.f32.mrb[3].mxu1  ;;  %v710_v19 = vadd.f32 %v2338_v15, %v3618_v4 }
 0x1b6   : > { %2704 = vtanh.f32 %v635_v9  ;;  %v638_v16 = vadd.f32 %v3618_v4, %v637_v13  ;;  %v702_v20 = vadd.f32 %v3618_v4, %v701_v18 }
 0x1b7   : > { %2706 = vtanh.f32 %v646_v12 }
 0x1b8   : > { %2708 = vtanh.f32 %v638_v16 }
 0x1b9   : > { %2710 = vtanh.f32 %v707_v14 }
 0x1ba   : > { %v2325_v21 = vpop.f32.mrb[4].mxu0  ;;  %2712 = vtanh.f32 %v699_v17  ;;  %v2341_v24 = vpop.f32.mrb[4].mxu1 }
 0x1bb   : > { %v659_v22 = vadd.f32 %v2325_v21, %v3618_v4  ;;  %v650_v23 = vpop.f32.mrb[5].mxu0  ;;  %2714 = vtanh.f32 %v710_v19  ;;  %v714_v27 = vpop.f32.mrb[5].mxu1  ;;  %v723_v30 = vadd.f32 %v2341_v24, %v3618_v4 }
 0x1bc   : > { %v651_v25 = vadd.f32 %v3618_v4, %v650_v23  ;;  %v2326_v26 = vpop.f32.mrb[6].mxu0  ;;  %2716 = vtanh.f32 %v702_v20  ;;  %v2342_v31 = vpop.f32.mrb[6].mxu1  ;;  %v715_v33 = vadd.f32 %v3618_v4, %v714_v27 }
 0x1bd   : > { %2718 = vtanh.f32 %v659_v22  ;;  %v662_v28 = vadd.f32 %v2326_v26, %v3618_v4  ;;  %v653_v29 = vpop.f32.mrb[7].mxu0  ;;  %v717_v34 = vpop.f32.mrb[7].mxu1  ;;  %v726_v36 = vadd.f32 %v2342_v31, %v3618_v4 }
 0x1be   : > { %2720 = vtanh.f32 %v651_v25  ;;  %v654_v32 = vadd.f32 %v3618_v4, %v653_v29  ;;  %v718_v38 = vadd.f32 %v3618_v4, %v717_v34 }
 0x1bf   : > { %v2703_v35 = vpop.eup %2702  ;;  %2722 = vtanh.f32 %v662_v28 }
 0x1c0   : > { %v2705_v37 = vpop.eup %2704  ;;  %2724 = vtanh.f32 %v654_v32 }
 0x1c1   : > { %v2707_v39 = vpop.eup %2706  ;;  %2726 = vtanh.f32 %v723_v30 }
 0x1c2   : > { %v2709_v40 = vpop.eup %2708  ;;  %v2329_v41 = vpop.f32.mrb[8].mxu0  ;;  %v794_v42 = vpack.c.bf16 %v2707_v39, %v2703_v35  ;;  %2728 = vtanh.f32 %v715_v33 }
 0x1c3   : > { %v3636_v43 = vpop.eup %2710  ;;  %v675_v44 = vadd.f32 %v2329_v41, %v3618_v4  ;;  %v666_v45 = vpop.f32.mrb[9].mxu0  ;;  %v793_v46 = vpack.c.bf16 %v2709_v40, %v2705_v37  ;;  %2730 = vtanh.f32 %v726_v36 }
 0x1c4   : > { %v2345_v47 = vpop.f32.mrb[8].mxu1  ;;  %v3639_v48 = vpop.eup %2712  ;;  %v667_v49 = vadd.f32 %v3618_v4, %v666_v45  ;;  %2732 = vtanh.f32 %v718_v38 }
 0x1c5   : > { %v2330_v50 = vpop.f32.mrb[10].mxu0  ;;  %v730_v51 = vpop.f32.mrb[9].mxu1  ;;  %2734 = vtanh.f32 %v675_v44  ;;  %2367 = vmatprep.mubr.bf16.mxu1 %v793_v46  ;;  %v739_v55 = vadd.f32 %v2345_v47, %v3618_v4 }
 0x1c6   : > { %v3642_v52 = vpop.eup %2714  ;;  %v678_v53 = vadd.f32 %v2330_v50, %v3618_v4  ;;  %v669_v54 = vpop.f32.mrb[11].mxu0  ;;  %2736 = vtanh.f32 %v667_v49  ;;  %2368 = vmatmul.mubr.bf16.vlgmr.msra.gmra.mrb[16].mxu1 %v794_v42  ;;  %v731_v59 = vadd.f32 %v3618_v4, %v730_v51 }
 0x1c7   : > { %v2346_v56 = vpop.f32.mrb[10].mxu1  ;;  %v3646_v57 = vpop.eup %2716  ;;  %v670_v58 = vadd.f32 %v3618_v4, %v669_v54  ;;  %v802_v61 = vpack.c.bf16 %v3642_v52, %v3636_v43  ;;  %v2686_v43 = vld [vmem:[#allocation10] sm:$0xff]   ;;  %v2687_v52 = vld [vmem:[#allocation10 + $0x8] sm:$0xff]  }
 0x1c8   : > { %v733_v60 = vpop.f32.mrb[11].mxu1  ;;  %v2719_v62 = vpop.eup %2718  ;;  %2738 = vtanh.f32 %v678_v53  ;;  %v742_v63 = vadd.f32 %v2346_v56, %v3618_v4  ;;  %v801_v0 = vpack.c.bf16 %v3646_v57, %v3639_v48  ;;  %v2682_v56 = vld [vmem:[#allocation8 + $0x20] sm:$0xff]   ;;  %v2685_v48 = vld [vmem:[#allocation8 + $0x38] sm:$0xff]   ;;  %2447 = vmatprep.subr.bf16.mxu1 %v2686_v43  ;;  %v2688_v57 = vld [vmem:[#allocation10 + $0x10] sm:$0xff]  }
 0x1c9   : > { %v2721_v1 = vpop.eup %2720  ;;  %2740 = vtanh.f32 %v670_v58  ;;  %v734_v2 = vadd.f32 %v3618_v4, %v733_v60  ;;  %2407 = vmatprep.subr.bf16.mxu0 %v2682_v56  ;;  %v2683_v58 = vld [vmem:[#allocation8 + $0x28] sm:$0xff]   ;;  %2448 = vmatpush3.bf16.msra.mxu1 %v2686_v43  ;;  %v2689_v60 = vld [vmem:[#allocation10 + $0x18] sm:$0xff]  }
 0x1ca   : > { %v2723_v3 = vpop.eup %2722  ;;  %2742 = vtanh.f32 %v739_v55  ;;  %v2333_v6 = vpop.f32.mrb[12].mxu0  ;;  %2408 = vmatpush3.bf16.msra.mxu0 %v2682_v56  ;;  %2449 = vmatprep.subr.bf16.mxu1 %v2687_v52 }
 0x1cb   : > { %v2725_v5 = vpop.eup %2724  ;;  %v796_v7 = vpack.c.bf16 %v2723_v3, %v2719_v62  ;;  %2744 = vtanh.f32 %v731_v59  ;;  %v691_v9 = vadd.f32 %v2333_v6, %v3618_v4  ;;  %v682_v10 = vpop.f32.mrb[13].mxu0  ;;  %2409 = vmatprep.subr.bf16.mxu0 %v2683_v58  ;;  %v2684_v59 = vld [vmem:[#allocation8 + $0x30] sm:$0xff]   ;;  %v2691_v62 = vld [vmem:[#allocation10 + $0x28] sm:$0xff]  }
 0x1cc   : > { %v3656_v8 = vpop.eup %2726  ;;  %v795_v11 = vpack.c.bf16 %v2725_v5, %v2721_v1  ;;  %2746 = vtanh.f32 %v742_v63  ;;  %v2349_v12 = vpop.f32.mrb[12].mxu1  ;;  %v683_v14 = vadd.f32 %v3618_v4, %v682_v10  ;;  %v3676_v63 = vld [vmem:[%s3944_s4] ss:$0 sm:$0xff] }
 0x1cd   : > { %v2729_v13 = vpop.eup %2728  ;;  %v2334_v15 = vpop.f32.mrb[14].mxu0  ;;  %2748 = vtanh.f32 %v734_v2  ;;  %v755_v20 = vadd.f32 %v2349_v12, %v3618_v4  ;;  %2450 = vmatpush3.bf16.msra.mxu1 %v2687_v52 }
 0x1ce   : > { %v746_v16 = vpop.f32.mrb[13].mxu1  ;;  %v2731_v17 = vpop.eup %2730  ;;  %2750 = vtanh.f32 %v691_v9  ;;  %v694_v18 = vadd.f32 %v2334_v15, %v3618_v4  ;;  %2371 = vmatprep.mubr.bf16.mxu1 %v795_v11  ;;  %2410 = vmatpush3.bf16.msra.mxu0 %v2683_v58 }
 0x1cf   : > { %v685_v19 = vpop.f32.mrb[15].mxu0  ;;  %v2350_v21 = vpop.f32.mrb[14].mxu1  ;;  %2752 = vtanh.f32 %v683_v14  ;;  %2372 = vmatmul.mubr.bf16.gmra.mrb[20].mxu1 %v796_v7  ;;  %v747_v24 = vadd.f32 %v3618_v4, %v746_v16  ;;  %v804_v26 = vpack.c.bf16 %v2731_v17, %v3656_v8  ;;  %2411 = vmatprep.subr.bf16.mxu0 %v2684_v59 }
 0x1d0   : > { %v2733_v22 = vpop.eup %2732  ;;  %v686_v23 = vadd.f32 %v3618_v4, %v685_v19  ;;  %v749_v25 = vpop.f32.mrb[15].mxu1  ;;  %2754 = vtanh.f32 %v694_v18  ;;  %v758_v28 = vadd.f32 %v2350_v21, %v3618_v4  ;;  %2451 = vmatprep.subr.bf16.mxu1 %v2688_v57 }
 0x1d1   : > { %v2735_v27 = vpop.eup %2734  ;;  %v803_v29 = vpack.c.bf16 %v2733_v22, %v2729_v13  ;;  %v750_v31 = vadd.f32 %v3618_v4, %v749_v25  ;;  %2452 = vmatpush3.bf16.msra.mxu1 %v2688_v57 }
 0x1d2   : > { %v2737_v30 = vpop.eup %2736  ;;  %2756 = vtanh.f32 %v686_v23  ;;  %2412 = vmatpush3.bf16.msra.mxu0 %v2684_v59  ;;  %2453 = vmatprep.subr.bf16.mxu1 %v2689_v60 }
 0x1d3   : > { %v2739_v32 = vpop.eup %2738  ;;  %2758 = vtanh.f32 %v755_v20  ;;  %2413 = vmatprep.subr.bf16.mxu0 %v2685_v48 }
 0x1d4   : > { %v2741_v33 = vpop.eup %2740  ;;  %v798_v34 = vpack.c.bf16 %v2739_v32, %v2735_v27  ;;  %2760 = vtanh.f32 %v747_v24 }
 0x1d5   : > { %v2743_v35 = vpop.eup %2742  ;;  %v797_v36 = vpack.c.bf16 %v2741_v33, %v2737_v30  ;;  %2762 = vtanh.f32 %v758_v28  ;;  %2454 = vmatpush3.bf16.msra.mxu1 %v2689_v60 }
 0x1d6   : > { %v2745_v37 = vpop.eup %2744  ;;  %2764 = vtanh.f32 %v750_v31  ;;  %2414 = vmatpush3.bf16.msra.mxu0 %v2685_v48 }
 0x1d7   : > { %v2747_v38 = vpop.eup %2746  ;;  %2375 = vmatprep.mubr.bf16.mxu1 %v797_v36 }
 0x1d8   : > { %v2749_v39 = vpop.eup %2748  ;;  %2376 = vmatmul.mubr.bf16.gmra.mrb[24].mxu1 %v798_v34  ;;  %v806_v40 = vpack.c.bf16 %v2747_v38, %v2743_v35 }
 0x1d9   : > { %v2751_v41 = vpop.eup %2750  ;;  %v805_v42 = vpack.c.bf16 %v2749_v39, %v2745_v37 }
 0x1da   : > { %v2753_v44 = vpop.eup %2752 }
 0x1db   : > { %v2755_v45 = vpop.eup %2754 }
 0x1dc   : > { %v2757_v4 = vpop.eup %2756  ;;  %v800_v46 = vpack.c.bf16 %v2755_v45, %v2751_v41 }
 0x1dd   : > { %v2759_v47 = vpop.eup %2758  ;;  %v799_v49 = vpack.c.bf16 %v2757_v4, %v2753_v44 }
 0x1de   : > { %v2761_v50 = vpop.eup %2760 }
 0x1df   : > { %v2763_v51 = vpop.eup %2762  ;;  %2379 = vmatprep.mubr.bf16.mxu1 %v799_v49 }
 0x1e0   : > { %v2765_v53 = vpop.eup %2764  ;;  %2380 = vmatmul.mubr.bf16.gmra.mrb[28].mxu1 %v800_v46  ;;  %v808_v54 = vpack.c.bf16 %v2763_v51, %v2759_v47 }
 0x1e1   : > { %2383 = vmatprep.mubr.bf16.mxu1 %v801_v0  ;;  %v807_v55 = vpack.c.bf16 %v2765_v53, %v2761_v50 }
 0x1e8   : > { %2384 = vmatmul.mubr.bf16.gmra.mrb[32].mxu1 %v802_v61  ;;  %v2690_v61 = vld [vmem:[#allocation10 + $0x20] sm:$0xff]  }
 0x1e9   : > { %2387 = vmatprep.mubr.bf16.mxu1 %v803_v29  ;;  %2455 = vmatprep.subr.bf16.mxu1 %v2690_v61 }
 0x1ea   : > { %2456 = vmatpush3.bf16.msra.mxu1 %v2690_v61 }
 0x1eb   : > { %2457 = vmatprep.subr.bf16.mxu1 %v2691_v62 }
 0x1ee   : > { %2458 = vmatpush3.bf16.msra.mxu1 %v2691_v62 }
 0x1f0   : > { %2388 = vmatmul.mubr.bf16.gmra.mrb[36].mxu1 %v804_v26 }
 0x1f1   : > { %2391 = vmatprep.mubr.bf16.mxu1 %v805_v42 }
 0x1f8   : > { %2392 = vmatmul.mubr.bf16.gmra.mrb[40].mxu1 %v806_v40 }
 0x1f9   : > { %2395 = vmatprep.mubr.bf16.mxu1 %v807_v55 }
 0x200   : > { %2396 = vmatmul.mubr.bf16.gmra.mrb[44].mxu1 %v808_v54 }
 0x299   : > { %v2369_v0 = vpop.f32.mrb[16].mxu1 }
 0x29a   : > { %v923_v1 = vadd.f32 %v2369_v0, %v3676_v63  ;;  %v914_v2 = vpop.f32.mrb[17].mxu1 }
 0x29b   : > { %v915_v3 = vadd.f32 %v3676_v63, %v914_v2  ;;  %v2370_v5 = vpop.f32.mrb[18].mxu1 }
 0x29c   : > { %2766 = vtanh.f32 %v923_v1  ;;  %v926_v6 = vadd.f32 %v2370_v5, %v3676_v63  ;;  %v917_v7 = vpop.f32.mrb[19].mxu1 }
 0x29d   : > { %2768 = vtanh.f32 %v915_v3  ;;  %v918_v8 = vadd.f32 %v3676_v63, %v917_v7 }
 0x29e   : > { %2770 = vtanh.f32 %v926_v6 }
 0x29f   : > { %2772 = vtanh.f32 %v918_v8 }
 0x2a2   : > { %v2373_v9 = vpop.f32.mrb[20].mxu1 }
 0x2a3   : > { %v939_v10 = vadd.f32 %v2373_v9, %v3676_v63  ;;  %v930_v11 = vpop.f32.mrb[21].mxu1 }
 0x2a4   : > { %v931_v12 = vadd.f32 %v3676_v63, %v930_v11  ;;  %v2374_v13 = vpop.f32.mrb[22].mxu1 }
 0x2a5   : > { %2774 = vtanh.f32 %v939_v10  ;;  %v942_v14 = vadd.f32 %v2374_v13, %v3676_v63  ;;  %v933_v15 = vpop.f32.mrb[23].mxu1 }
 0x2a6   : > { %2776 = vtanh.f32 %v931_v12  ;;  %v934_v16 = vadd.f32 %v3676_v63, %v933_v15  ;;  %v2767_v17 = vpop.eup %2766 }
 0x2a7   : > { %2778 = vtanh.f32 %v942_v14  ;;  %v2769_v18 = vpop.eup %2768 }
 0x2a8   : > { %2780 = vtanh.f32 %v934_v16  ;;  %v2771_v19 = vpop.eup %2770 }
 0x2a9   : > { %v2773_v20 = vpop.eup %2772  ;;  %v1074_v22 = vpack.c.bf16 %v2771_v19, %v2767_v17 }
 0x2aa   : > { %v1073_v25 = vpack.c.bf16 %v2773_v20, %v2769_v18 }
 0x2ab   : > { %v2377_v21 = vpop.f32.mrb[24].mxu1 }
 0x2ac   : > { %v955_v23 = vadd.f32 %v2377_v21, %v3676_v63  ;;  %v946_v24 = vpop.f32.mrb[25].mxu1  ;;  %2415 = vmatprep.mubr.bf16.mxu0 %v1073_v25 }
 0x2ad   : > { %v947_v26 = vadd.f32 %v3676_v63, %v946_v24  ;;  %v2378_v27 = vpop.f32.mrb[26].mxu1  ;;  %2416 = vmatmul.mubr.bf16.vlgmr.msra.gmra.mrb[16].mxu0 %v1074_v22 }
 0x2ae   : > { %2782 = vtanh.f32 %v955_v23  ;;  %v958_v28 = vadd.f32 %v2378_v27, %v3676_v63  ;;  %v949_v29 = vpop.f32.mrb[27].mxu1 }
 0x2af   : > { %2784 = vtanh.f32 %v947_v26  ;;  %v950_v30 = vadd.f32 %v3676_v63, %v949_v29  ;;  %v2775_v31 = vpop.eup %2774 }
 0x2b0   : > { %2786 = vtanh.f32 %v958_v28  ;;  %v2777_v32 = vpop.eup %2776 }
 0x2b1   : > { %2788 = vtanh.f32 %v950_v30  ;;  %v2779_v33 = vpop.eup %2778 }
 0x2b2   : > { %v2781_v34 = vpop.eup %2780  ;;  %v1076_v36 = vpack.c.bf16 %v2779_v33, %v2775_v31 }
 0x2b3   : > { %v2381_v35 = vpop.f32.mrb[28].mxu1  ;;  %v1075_v39 = vpack.c.bf16 %v2781_v34, %v2777_v32 }
 0x2b4   : > { %v971_v37 = vadd.f32 %v2381_v35, %v3676_v63  ;;  %v962_v38 = vpop.f32.mrb[29].mxu1 }
 0x2b5   : > { %v963_v40 = vadd.f32 %v3676_v63, %v962_v38  ;;  %v2382_v41 = vpop.f32.mrb[30].mxu1  ;;  %2419 = vmatprep.mubr.bf16.mxu0 %v1075_v39 }
 0x2b6   : > { %2790 = vtanh.f32 %v971_v37  ;;  %v974_v42 = vadd.f32 %v2382_v41, %v3676_v63  ;;  %v965_v44 = vpop.f32.mrb[31].mxu1  ;;  %2420 = vmatmul.mubr.bf16.gmra.mrb[20].mxu0 %v1076_v36 }
 0x2b7   : > { %2792 = vtanh.f32 %v963_v40  ;;  %v966_v45 = vadd.f32 %v3676_v63, %v965_v44 }
 0x2b8   : > { %v2783_v4 = vpop.eup %2782  ;;  %2794 = vtanh.f32 %v974_v42 }
 0x2b9   : > { %v2785_v46 = vpop.eup %2784  ;;  %2796 = vtanh.f32 %v966_v45 }
 0x2ba   : > { %v2787_v47 = vpop.eup %2786 }
 0x2bb   : > { %v2789_v49 = vpop.eup %2788  ;;  %v2385_v50 = vpop.f32.mrb[32].mxu1  ;;  %v1078_v51 = vpack.c.bf16 %v2787_v47, %v2783_v4 }
 0x2bc   : > { %v987_v53 = vadd.f32 %v2385_v50, %v3676_v63  ;;  %v978_v54 = vpop.f32.mrb[33].mxu1  ;;  %v1077_v55 = vpack.c.bf16 %v2789_v49, %v2785_v46 }
 0x2bd   : > { %v979_v56 = vadd.f32 %v3676_v63, %v978_v54  ;;  %v2386_v58 = vpop.f32.mrb[34].mxu1  ;;  %v2695_v54 = vld [vmem:[#allocation11 + $0x8] sm:$0xff]  }
 0x2be   : > { %2798 = vtanh.f32 %v987_v53  ;;  %v990_v59 = vadd.f32 %v2386_v58, %v3676_v63  ;;  %v981_v48 = vpop.f32.mrb[35].mxu1  ;;  %2423 = vmatprep.mubr.bf16.mxu0 %v1077_v55  ;;  %v2694_v53 = vld [vmem:[#allocation11] sm:$0xff]   ;;  %v2696_v55 = vld [vmem:[#allocation11 + $0x10] sm:$0xff]  }
 0x2bf   : > { %2800 = vtanh.f32 %v979_v56  ;;  %v982_v43 = vadd.f32 %v3676_v63, %v981_v48  ;;  %2424 = vmatmul.mubr.bf16.gmra.mrb[24].mxu0 %v1078_v51  ;;  %v2693_v51 = vld [vmem:[#allocation10 + $0x38] sm:$0xff]   ;;  %2495 = vmatprep.subr.bf16.mxu0 %v2694_v53  ;;  %v2698_v58 = vld [vmem:[#allocation11 + $0x20] sm:$0xff]  }
 0x2c0   : > { %v2791_v52 = vpop.eup %2790  ;;  %2802 = vtanh.f32 %v990_v59  ;;  %2496 = vmatpush3.bf16.msra.mxu0 %v2694_v53  ;;  %v2697_v56 = vld [vmem:[#allocation11 + $0x18] sm:$0xff]   ;;  %v2699_v59 = vld [vmem:[#allocation11 + $0x28] sm:$0xff]   ;;  %v3713_v48 = vld [vmem:[%s3946_s6] ss:$0 sm:$0xff] }
 0x2c1   : > { %v2793_v57 = vpop.eup %2792  ;;  %2804 = vtanh.f32 %v982_v43  ;;  %2497 = vmatprep.subr.bf16.mxu0 %v2695_v54 }
 0x2c2   : > { %v2795_v60 = vpop.eup %2794 }
 0x2c3   : > { %v2797_v61 = vpop.eup %2796  ;;  %v2389_v62 = vpop.f32.mrb[36].mxu1  ;;  %v1080_v0 = vpack.c.bf16 %v2795_v60, %v2791_v52 }
 0x2c4   : > { %v1003_v1 = vadd.f32 %v2389_v62, %v3676_v63  ;;  %v994_v2 = vpop.f32.mrb[37].mxu1  ;;  %v1079_v3 = vpack.c.bf16 %v2797_v61, %v2793_v57  ;;  %2498 = vmatpush3.bf16.msra.mxu0 %v2695_v54 }
 0x2c5   : > { %v995_v5 = vadd.f32 %v3676_v63, %v994_v2  ;;  %v2390_v6 = vpop.f32.mrb[38].mxu1  ;;  %2499 = vmatprep.subr.bf16.mxu0 %v2696_v55 }
 0x2c6   : > { %2806 = vtanh.f32 %v1003_v1  ;;  %v1006_v7 = vadd.f32 %v2390_v6, %v3676_v63  ;;  %v997_v8 = vpop.f32.mrb[39].mxu1  ;;  %2427 = vmatprep.mubr.bf16.mxu0 %v1079_v3 }
 0x2c7   : > { %2808 = vtanh.f32 %v995_v5  ;;  %v998_v9 = vadd.f32 %v3676_v63, %v997_v8  ;;  %2428 = vmatmul.mubr.bf16.gmra.mrb[28].mxu0 %v1080_v0 }
 0x2c8   : > { %v2799_v10 = vpop.eup %2798  ;;  %2810 = vtanh.f32 %v1006_v7  ;;  %2500 = vmatpush3.bf16.msra.mxu0 %v2696_v55 }
 0x2c9   : > { %v2801_v11 = vpop.eup %2800  ;;  %2812 = vtanh.f32 %v998_v9  ;;  %2501 = vmatprep.subr.bf16.mxu0 %v2697_v56 }
 0x2ca   : > { %v2803_v12 = vpop.eup %2802 }
 0x2cb   : > { %v2805_v13 = vpop.eup %2804  ;;  %v2393_v14 = vpop.f32.mrb[40].mxu1  ;;  %v1082_v15 = vpack.c.bf16 %v2803_v12, %v2799_v10 }
 0x2cc   : > { %v1019_v16 = vadd.f32 %v2393_v14, %v3676_v63  ;;  %v1010_v17 = vpop.f32.mrb[41].mxu1  ;;  %v1081_v18 = vpack.c.bf16 %v2805_v13, %v2801_v11  ;;  %2502 = vmatpush3.bf16.msra.mxu0 %v2697_v56 }
 0x2cd   : > { %v1011_v19 = vadd.f32 %v3676_v63, %v1010_v17  ;;  %v2394_v20 = vpop.f32.mrb[42].mxu1  ;;  %2503 = vmatprep.subr.bf16.mxu0 %v2698_v58 }
 0x2ce   : > { %2814 = vtanh.f32 %v1019_v16  ;;  %v1022_v21 = vadd.f32 %v2394_v20, %v3676_v63  ;;  %v1013_v22 = vpop.f32.mrb[43].mxu1  ;;  %2431 = vmatprep.mubr.bf16.mxu0 %v1081_v18 }
 0x2cf   : > { %2816 = vtanh.f32 %v1011_v19  ;;  %v1014_v23 = vadd.f32 %v3676_v63, %v1013_v22  ;;  %2432 = vmatmul.mubr.bf16.gmra.mrb[32].mxu0 %v1082_v15 }
 0x2d0   : > { %v2807_v24 = vpop.eup %2806  ;;  %2818 = vtanh.f32 %v1022_v21  ;;  %2504 = vmatpush3.bf16.msra.mxu0 %v2698_v58 }
 0x2d1   : > { %v2809_v25 = vpop.eup %2808  ;;  %2820 = vtanh.f32 %v1014_v23  ;;  %2505 = vmatprep.subr.bf16.mxu0 %v2699_v59 }
 0x2d2   : > { %v2811_v26 = vpop.eup %2810 }
 0x2d3   : > { %v2813_v27 = vpop.eup %2812  ;;  %v2397_v28 = vpop.f32.mrb[44].mxu1  ;;  %v1084_v29 = vpack.c.bf16 %v2811_v26, %v2807_v24 }
 0x2d4   : > { %v1035_v30 = vadd.f32 %v2397_v28, %v3676_v63  ;;  %v1026_v31 = vpop.f32.mrb[45].mxu1  ;;  %v1083_v32 = vpack.c.bf16 %v2813_v27, %v2809_v25  ;;  %2506 = vmatpush3.bf16.msra.mxu0 %v2699_v59 }
 0x2d5   : > { %v1027_v33 = vadd.f32 %v3676_v63, %v1026_v31  ;;  %v2398_v34 = vpop.f32.mrb[46].mxu1 }
 0x2d6   : > { %2822 = vtanh.f32 %v1035_v30  ;;  %v1038_v35 = vadd.f32 %v2398_v34, %v3676_v63  ;;  %v1029_v36 = vpop.f32.mrb[47].mxu1  ;;  %2435 = vmatprep.mubr.bf16.mxu0 %v1083_v32 }
 0x2d7   : > { %2824 = vtanh.f32 %v1027_v33  ;;  %v1030_v37 = vadd.f32 %v3676_v63, %v1029_v36  ;;  %2436 = vmatmul.mubr.bf16.gmra.mrb[36].mxu0 %v1084_v29  ;;  %v2692_v63 = vld [vmem:[#allocation10 + $0x30] sm:$0xff]  }
 0x2d8   : > { %v2815_v38 = vpop.eup %2814  ;;  %2826 = vtanh.f32 %v1038_v35  ;;  %2459 = vmatprep.subr.bf16.mxu1 %v2692_v63 }
 0x2d9   : > { %v2817_v39 = vpop.eup %2816  ;;  %2828 = vtanh.f32 %v1030_v37  ;;  %2460 = vmatpush3.bf16.msra.mxu1 %v2692_v63 }
 0x2da   : > { %v2819_v40 = vpop.eup %2818  ;;  %2461 = vmatprep.subr.bf16.mxu1 %v2693_v51 }
 0x2db   : > { %v2821_v41 = vpop.eup %2820  ;;  %v1086_v42 = vpack.c.bf16 %v2819_v40, %v2815_v38 }
 0x2dc   : > { %v1085_v44 = vpack.c.bf16 %v2821_v41, %v2817_v39 }
 0x2dd   : > { %2462 = vmatpush3.bf16.msra.mxu1 %v2693_v51 }
 0x2de   : > { %2439 = vmatprep.mubr.bf16.mxu0 %v1085_v44 }
 0x2df   : > { %2440 = vmatmul.mubr.bf16.gmra.mrb[40].mxu0 %v1086_v42 }
 0x2e0   : > { %v2823_v45 = vpop.eup %2822 }
 0x2e1   : > { %v2825_v4 = vpop.eup %2824 }
 0x2e2   : > { %v2827_v46 = vpop.eup %2826 }
 0x2e3   : > { %v2829_v47 = vpop.eup %2828  ;;  %v1088_v49 = vpack.c.bf16 %v2827_v46, %v2823_v45 }
 0x2e4   : > { %v1087_v50 = vpack.c.bf16 %v2829_v47, %v2825_v4 }
 0x2e6   : > { %2443 = vmatprep.mubr.bf16.mxu0 %v1087_v50 }
 0x2e7   : > { %2444 = vmatmul.mubr.bf16.gmra.mrb[44].mxu0 %v1088_v49 }
 0x380   : > { %v2417_v43 = vpop.f32.mrb[16].mxu0 }
 0x381   : > { %v1203_v52 = vadd.f32 %v2417_v43, %v3713_v48  ;;  %v1194_v57 = vpop.f32.mrb[17].mxu0 }
 0x382   : > { %v1195_v60 = vadd.f32 %v3713_v48, %v1194_v57  ;;  %v2418_v61 = vpop.f32.mrb[18].mxu0 }
 0x383   : > { %2830 = vtanh.f32 %v1203_v52  ;;  %v1206_v62 = vadd.f32 %v2418_v61, %v3713_v48  ;;  %v1197_v0 = vpop.f32.mrb[19].mxu0 }
 0x384   : > { %2832 = vtanh.f32 %v1195_v60  ;;  %v1198_v1 = vadd.f32 %v3713_v48, %v1197_v0 }
 0x385   : > { %2834 = vtanh.f32 %v1206_v62 }
 0x386   : > { %2836 = vtanh.f32 %v1198_v1 }
 0x389   : > { %v2421_v2 = vpop.f32.mrb[20].mxu0 }
 0x38a   : > { %v1219_v3 = vadd.f32 %v2421_v2, %v3713_v48  ;;  %v1210_v5 = vpop.f32.mrb[21].mxu0 }
 0x38b   : > { %v1211_v6 = vadd.f32 %v3713_v48, %v1210_v5  ;;  %v2422_v7 = vpop.f32.mrb[22].mxu0 }
 0x38c   : > { %2838 = vtanh.f32 %v1219_v3  ;;  %v1222_v8 = vadd.f32 %v2422_v7, %v3713_v48  ;;  %v1213_v9 = vpop.f32.mrb[23].mxu0 }
 0x38d   : > { %2840 = vtanh.f32 %v1211_v6  ;;  %v1214_v10 = vadd.f32 %v3713_v48, %v1213_v9  ;;  %v2831_v11 = vpop.eup %2830 }
 0x38e   : > { %2842 = vtanh.f32 %v1222_v8  ;;  %v2833_v12 = vpop.eup %2832 }
 0x38f   : > { %2844 = vtanh.f32 %v1214_v10  ;;  %v2835_v13 = vpop.eup %2834 }
 0x390   : > { %v2837_v14 = vpop.eup %2836  ;;  %v1354_v16 = vpack.c.bf16 %v2835_v13, %v2831_v11 }
 0x391   : > { %v1353_v19 = vpack.c.bf16 %v2837_v14, %v2833_v12 }
 0x392   : > { %v2425_v15 = vpop.f32.mrb[24].mxu0 }
 0x393   : > { %v1235_v17 = vadd.f32 %v2425_v15, %v3713_v48  ;;  %v1226_v18 = vpop.f32.mrb[25].mxu0  ;;  %2463 = vmatprep.mubr.bf16.mxu1 %v1353_v19 }
 0x394   : > { %v1227_v20 = vadd.f32 %v3713_v48, %v1226_v18  ;;  %v2426_v21 = vpop.f32.mrb[26].mxu0  ;;  %2464 = vmatmul.mubr.bf16.vlgmr.msra.gmra.mrb[48].mxu1 %v1354_v16 }
 0x395   : > { %2846 = vtanh.f32 %v1235_v17  ;;  %v1238_v22 = vadd.f32 %v2426_v21, %v3713_v48  ;;  %v1229_v23 = vpop.f32.mrb[27].mxu0 }
 0x396   : > { %2848 = vtanh.f32 %v1227_v20  ;;  %v1230_v24 = vadd.f32 %v3713_v48, %v1229_v23  ;;  %v2839_v25 = vpop.eup %2838 }
 0x397   : > { %2850 = vtanh.f32 %v1238_v22  ;;  %v2841_v26 = vpop.eup %2840 }
 0x398   : > { %2852 = vtanh.f32 %v1230_v24  ;;  %v2843_v27 = vpop.eup %2842 }
 0x399   : > { %v2845_v28 = vpop.eup %2844  ;;  %v1356_v30 = vpack.c.bf16 %v2843_v27, %v2839_v25 }
 0x39a   : > { %v2429_v29 = vpop.f32.mrb[28].mxu0  ;;  %v1355_v33 = vpack.c.bf16 %v2845_v28, %v2841_v26 }
 0x39b   : > { %v1251_v31 = vadd.f32 %v2429_v29, %v3713_v48  ;;  %v1242_v32 = vpop.f32.mrb[29].mxu0 }
 0x39c   : > { %v1243_v34 = vadd.f32 %v3713_v48, %v1242_v32  ;;  %v2430_v35 = vpop.f32.mrb[30].mxu0  ;;  %2467 = vmatprep.mubr.bf16.mxu1 %v1355_v33 }
 0x39d   : > { %2854 = vtanh.f32 %v1251_v31  ;;  %v1254_v36 = vadd.f32 %v2430_v35, %v3713_v48  ;;  %v1245_v37 = vpop.f32.mrb[31].mxu0  ;;  %2468 = vmatmul.mubr.bf16.gmra.mrb[52].mxu1 %v1356_v30 }
 0x39e   : > { %2856 = vtanh.f32 %v1243_v34  ;;  %v1246_v38 = vadd.f32 %v3713_v48, %v1245_v37 }
 0x39f   : > { %v2847_v39 = vpop.eup %2846  ;;  %2858 = vtanh.f32 %v1254_v36 }
 0x3a0   : > { %v2849_v40 = vpop.eup %2848  ;;  %2860 = vtanh.f32 %v1246_v38 }
 0x3a1   : > { %v2851_v41 = vpop.eup %2850 }
 0x3a2   : > { %v2853_v42 = vpop.eup %2852  ;;  %v2433_v44 = vpop.f32.mrb[32].mxu0  ;;  %v1358_v45 = vpack.c.bf16 %v2851_v41, %v2847_v39 }
 0x3a3   : > { %v1267_v4 = vadd.f32 %v2433_v44, %v3713_v48  ;;  %v1258_v46 = vpop.f32.mrb[33].mxu0  ;;  %v1357_v47 = vpack.c.bf16 %v2853_v42, %v2849_v40 }
 0x3a4   : > { %v1259_v49 = vadd.f32 %v3713_v48, %v1258_v46  ;;  %v2434_v50 = vpop.f32.mrb[34].mxu0 }
 0x3a5   : > { %2862 = vtanh.f32 %v1267_v4  ;;  %v1270_v63 = vadd.f32 %v2434_v50, %v3713_v48  ;;  %v1261_v51 = vpop.f32.mrb[35].mxu0  ;;  %2471 = vmatprep.mubr.bf16.mxu1 %v1357_v47  ;;  %v3750_v4 = vld [vmem:[%s3976_s1] ss:$0 sm:$0xff]  ;;  %s3164_s1 = sshll.u32 %s3250_s15, 4  ;;  %s3165_s1 = int_to_ptr.vmem [resolvable:$false] %s3164_s1 }
 0x3a6   : > { %2864 = vtanh.f32 %v1259_v49  ;;  %v1262_v53 = vadd.f32 %v3713_v48, %v1261_v51  ;;  %2472 = vmatmul.mubr.bf16.gmra.mrb[56].mxu1 %v1358_v45  ;;  %v2701_v45 = vld [vmem:[#allocation11 + $0x38] sm:$0xff]   ;;  %s3166_s21 = scalar_lea.vmem %s3165_s1, 8192  ;;  %p3167_p13 = scmp.lt.s32.totalorder %s3893_s26, %s3165_s1 }
 0x3a7   : > { %v2855_v54 = vpop.eup %2854  ;;  %2866 = vtanh.f32 %v1270_v63 }
 0x3a8   : > { %v2857_v55 = vpop.eup %2856  ;;  %2868 = vtanh.f32 %v1262_v53 }
 0x3a9   : > { %v2859_v56 = vpop.eup %2858 }
 0x3aa   : > { %v2861_v58 = vpop.eup %2860  ;;  %v2437_v59 = vpop.f32.mrb[36].mxu0  ;;  %v1360_v43 = vpack.c.bf16 %v2859_v56, %v2855_v54 }
 0x3ab   : > { %v1283_v52 = vadd.f32 %v2437_v59, %v3713_v48  ;;  %v1274_v57 = vpop.f32.mrb[37].mxu0  ;;  %v1359_v60 = vpack.c.bf16 %v2861_v58, %v2857_v55 }
 0x3ac   : > { %v1275_v61 = vadd.f32 %v3713_v48, %v1274_v57  ;;  %v2438_v62 = vpop.f32.mrb[38].mxu0 }
 0x3ad   : > { %2870 = vtanh.f32 %v1283_v52  ;;  %v1286_v0 = vadd.f32 %v2438_v62, %v3713_v48  ;;  %v1277_v1 = vpop.f32.mrb[39].mxu0  ;;  %2475 = vmatprep.mubr.bf16.mxu1 %v1359_v60 }
 0x3ae   : > { %2872 = vtanh.f32 %v1275_v61  ;;  %v1278_v2 = vadd.f32 %v3713_v48, %v1277_v1  ;;  %2476 = vmatmul.mubr.bf16.gmra.mrb[60].mxu1 %v1360_v43 }
 0x3af   : > { %v2863_v3 = vpop.eup %2862  ;;  %2874 = vtanh.f32 %v1286_v0 }
 0x3b0   : > { %v2865_v5 = vpop.eup %2864  ;;  %2876 = vtanh.f32 %v1278_v2 }
 0x3b1   : > { %v2867_v6 = vpop.eup %2866 }
 0x3b2   : > { %v2869_v7 = vpop.eup %2868  ;;  %v2441_v8 = vpop.f32.mrb[40].mxu0  ;;  %v1362_v9 = vpack.c.bf16 %v2867_v6, %v2863_v3 }
 0x3b3   : > { %v1299_v10 = vadd.f32 %v2441_v8, %v3713_v48  ;;  %v1290_v11 = vpop.f32.mrb[41].mxu0  ;;  %v1361_v12 = vpack.c.bf16 %v2869_v7, %v2865_v5 }
 0x3b4   : > { %v1291_v13 = vadd.f32 %v3713_v48, %v1290_v11  ;;  %v2442_v14 = vpop.f32.mrb[42].mxu0 }
 0x3b5   : > { %2878 = vtanh.f32 %v1299_v10  ;;  %v1302_v15 = vadd.f32 %v2442_v14, %v3713_v48  ;;  %v1293_v16 = vpop.f32.mrb[43].mxu0  ;;  %2479 = vmatprep.mubr.bf16.mxu1 %v1361_v12 }
 0x3b6   : > { %2880 = vtanh.f32 %v1291_v13  ;;  %v1294_v17 = vadd.f32 %v3713_v48, %v1293_v16  ;;  %2480 = vmatmul.mubr.bf16.gmra.mrb[64].mxu1 %v1362_v9 }
 0x3b7   : > { %v2871_v18 = vpop.eup %2870  ;;  %2882 = vtanh.f32 %v1302_v15 }
 0x3b8   : > { %v2873_v19 = vpop.eup %2872  ;;  %2884 = vtanh.f32 %v1294_v17 }
 0x3b9   : > { %v2875_v20 = vpop.eup %2874 }
 0x3ba   : > { %v2877_v21 = vpop.eup %2876  ;;  %v2445_v22 = vpop.f32.mrb[44].mxu0  ;;  %v1364_v23 = vpack.c.bf16 %v2875_v20, %v2871_v18 }
 0x3bb   : > { %v1315_v24 = vadd.f32 %v2445_v22, %v3713_v48  ;;  %v1306_v25 = vpop.f32.mrb[45].mxu0  ;;  %v1363_v26 = vpack.c.bf16 %v2877_v21, %v2873_v19 }
 0x3bc   : > { %v1307_v27 = vadd.f32 %v3713_v48, %v1306_v25  ;;  %v2446_v28 = vpop.f32.mrb[46].mxu0 }
 0x3bd   : > { %2886 = vtanh.f32 %v1315_v24  ;;  %v1318_v29 = vadd.f32 %v2446_v28, %v3713_v48  ;;  %v1309_v30 = vpop.f32.mrb[47].mxu0  ;;  %2483 = vmatprep.mubr.bf16.mxu1 %v1363_v26 }
 0x3be   : > { %2888 = vtanh.f32 %v1307_v27  ;;  %v1310_v31 = vadd.f32 %v3713_v48, %v1309_v30  ;;  %2484 = vmatmul.mubr.bf16.gmra.mrb[68].mxu1 %v1364_v23  ;;  %v2700_v48 = vld [vmem:[#allocation11 + $0x30] sm:$0xff]  }
 0x3bf   : > { %v2879_v32 = vpop.eup %2878  ;;  %2890 = vtanh.f32 %v1318_v29  ;;  %2507 = vmatprep.subr.bf16.mxu0 %v2700_v48 }
 0x3c0   : > { %v2881_v33 = vpop.eup %2880  ;;  %2892 = vtanh.f32 %v1310_v31  ;;  %2508 = vmatpush3.bf16.msra.mxu0 %v2700_v48 }
 0x3c1   : > { %v2883_v34 = vpop.eup %2882  ;;  %2509 = vmatprep.subr.bf16.mxu0 %v2701_v45 }
 0x3c2   : > { %v2885_v35 = vpop.eup %2884  ;;  %v1366_v36 = vpack.c.bf16 %v2883_v34, %v2879_v32 }
 0x3c3   : > { %v1365_v37 = vpack.c.bf16 %v2885_v35, %v2881_v33 }
 0x3c4   : > { %2510 = vmatpush3.bf16.msra.mxu0 %v2701_v45 }
 0x3c5   : > { %2487 = vmatprep.mubr.bf16.mxu1 %v1365_v37 }
 0x3c6   : > { %2488 = vmatmul.mubr.bf16.gmra.mrb[72].mxu1 %v1366_v36 }
 0x3c7   : > { %v2887_v38 = vpop.eup %2886 }
 0x3c8   : > { %v2889_v39 = vpop.eup %2888 }
 0x3c9   : > { %v2891_v40 = vpop.eup %2890 }
 0x3ca   : > { %v2893_v41 = vpop.eup %2892  ;;  %v1368_v42 = vpack.c.bf16 %v2891_v40, %v2887_v38 }
 0x3cb   : > { %v1367_v44 = vpack.c.bf16 %v2893_v41, %v2889_v39 }
 0x3cd   : > { %2491 = vmatprep.mubr.bf16.mxu1 %v1367_v44 }
 0x3ce   : > { %2492 = vmatmul.mubr.bf16.gmra.mrb[76].mxu1 %v1368_v42 }
 0x467   : > { %v2465_v46 = vpop.f32.mrb[48].mxu1 }
 0x468   : > { %v1483_v47 = vadd.f32 %v2465_v46, %v3750_v4  ;;  %v1474_v49 = vpop.f32.mrb[49].mxu1 }
 0x469   : > { %v1475_v50 = vadd.f32 %v3750_v4, %v1474_v49  ;;  %v2466_v63 = vpop.f32.mrb[50].mxu1 }
 0x46a   : > { %2894 = vtanh.f32 %v1483_v47  ;;  %v1486_v51 = vadd.f32 %v2466_v63, %v3750_v4  ;;  %v1477_v53 = vpop.f32.mrb[51].mxu1 }
 0x46b   : > { %2896 = vtanh.f32 %v1475_v50  ;;  %v1478_v54 = vadd.f32 %v3750_v4, %v1477_v53 }
 0x46c   : > { %2898 = vtanh.f32 %v1486_v51 }
 0x46d   : > { %2900 = vtanh.f32 %v1478_v54 }
 0x470   : > { %v2469_v55 = vpop.f32.mrb[52].mxu1 }
 0x471   : > { %v1499_v56 = vadd.f32 %v2469_v55, %v3750_v4  ;;  %v1490_v58 = vpop.f32.mrb[53].mxu1 }
 0x472   : > { %v1491_v59 = vadd.f32 %v3750_v4, %v1490_v58  ;;  %v2470_v43 = vpop.f32.mrb[54].mxu1 }
 0x473   : > { %2902 = vtanh.f32 %v1499_v56  ;;  %v1502_v52 = vadd.f32 %v2470_v43, %v3750_v4  ;;  %v1493_v57 = vpop.f32.mrb[55].mxu1 }
 0x474   : > { %2904 = vtanh.f32 %v1491_v59  ;;  %v1494_v60 = vadd.f32 %v3750_v4, %v1493_v57  ;;  %v2895_v61 = vpop.eup %2894 }
 0x475   : > { %2906 = vtanh.f32 %v1502_v52  ;;  %v2897_v62 = vpop.eup %2896 }
 0x476   : > { %2908 = vtanh.f32 %v1494_v60  ;;  %v2899_v0 = vpop.eup %2898 }
 0x477   : > { %v2901_v1 = vpop.eup %2900  ;;  %v1634_v3 = vpack.c.bf16 %v2899_v0, %v2895_v61 }
 0x478   : > { %v1633_v7 = vpack.c.bf16 %v2901_v1, %v2897_v62 }
 0x479   : > { %v2473_v2 = vpop.f32.mrb[56].mxu1 }
 0x47a   : > { %v1515_v5 = vadd.f32 %v2473_v2, %v3750_v4  ;;  %v1506_v6 = vpop.f32.mrb[57].mxu1  ;;  %2511 = vmatprep.mubr.bf16.mxu0 %v1633_v7 }
 0x47b   : > { %v1507_v8 = vadd.f32 %v3750_v4, %v1506_v6  ;;  %v2474_v9 = vpop.f32.mrb[58].mxu1  ;;  %2512 = vmatmul.mubr.bf16.vlgmr.msra.gmra.mrb[48].mxu0 %v1634_v3 }
 0x47c   : > { %2910 = vtanh.f32 %v1515_v5  ;;  %v1518_v10 = vadd.f32 %v2474_v9, %v3750_v4  ;;  %v1509_v11 = vpop.f32.mrb[59].mxu1 }
 0x47d   : > { %2912 = vtanh.f32 %v1507_v8  ;;  %v1510_v12 = vadd.f32 %v3750_v4, %v1509_v11  ;;  %v2903_v13 = vpop.eup %2902 }
 0x47e   : > { %2914 = vtanh.f32 %v1518_v10  ;;  %v2905_v14 = vpop.eup %2904 }
 0x47f   : > { %2916 = vtanh.f32 %v1510_v12  ;;  %v2907_v15 = vpop.eup %2906 }
 0x480   : > { %v2909_v16 = vpop.eup %2908  ;;  %v1636_v18 = vpack.c.bf16 %v2907_v15, %v2903_v13 }
 0x481   : > { %v2477_v17 = vpop.f32.mrb[60].mxu1  ;;  %v1635_v21 = vpack.c.bf16 %v2909_v16, %v2905_v14 }
 0x482   : > { %v1531_v19 = vadd.f32 %v2477_v17, %v3750_v4  ;;  %v1522_v20 = vpop.f32.mrb[61].mxu1 }
 0x483   : > { %v1523_v22 = vadd.f32 %v3750_v4, %v1522_v20  ;;  %v2478_v23 = vpop.f32.mrb[62].mxu1  ;;  %2515 = vmatprep.mubr.bf16.mxu0 %v1635_v21 }
 0x484   : > { %2918 = vtanh.f32 %v1531_v19  ;;  %v1534_v24 = vadd.f32 %v2478_v23, %v3750_v4  ;;  %v1525_v25 = vpop.f32.mrb[63].mxu1  ;;  %2516 = vmatmul.mubr.bf16.gmra.mrb[52].mxu0 %v1636_v18 }
 0x485   : > { %2920 = vtanh.f32 %v1523_v22  ;;  %v1526_v26 = vadd.f32 %v3750_v4, %v1525_v25 }
 0x486   : > { %v2911_v27 = vpop.eup %2910  ;;  %2922 = vtanh.f32 %v1534_v24 }
 0x487   : > { %v2913_v28 = vpop.eup %2912  ;;  %2924 = vtanh.f32 %v1526_v26 }
 0x488   : > { %v2915_v29 = vpop.eup %2914 }
 0x489   : > { %v2917_v30 = vpop.eup %2916  ;;  %v2481_v31 = vpop.f32.mrb[64].mxu1  ;;  %v1638_v32 = vpack.c.bf16 %v2915_v29, %v2911_v27 }
 0x48a   : > { %v1547_v33 = vadd.f32 %v2481_v31, %v3750_v4  ;;  %v1538_v34 = vpop.f32.mrb[65].mxu1  ;;  %v1637_v35 = vpack.c.bf16 %v2917_v30, %v2913_v28  ;;  %v3787_v31 = vld [vmem:[%s3977_s24] ss:$0 sm:$0xff] }
 0x48b   : > { %v1539_v36 = vadd.f32 %v3750_v4, %v1538_v34  ;;  %v2482_v37 = vpop.f32.mrb[66].mxu1  ;;  %v2959_v34 = vld [vmem:[%s3565_s22] sm:$0xff] }
 0x48c   : > { %2926 = vtanh.f32 %v1547_v33  ;;  %v1550_v38 = vadd.f32 %v2482_v37, %v3750_v4  ;;  %v1541_v39 = vpop.f32.mrb[67].mxu1  ;;  %2519 = vmatprep.mubr.bf16.mxu0 %v1637_v35  ;;  %v1881_v35 = vsub.f32 1.0, %v2959_v34 }
 0x48d   : > { %2928 = vtanh.f32 %v1539_v36  ;;  %v1542_v40 = vadd.f32 %v3750_v4, %v1541_v39  ;;  %2520 = vmatmul.mubr.bf16.gmra.mrb[56].mxu0 %v1638_v32  ;;  %v2958_v32 = vld [vmem:[%s3565_s22 + $0x10] sm:$0xff]  ;;  %v2960_v39 = vld [vmem:[%s3565_s22 + $0x18] sm:$0xff] }
 0x48e   : > { %v2919_v41 = vpop.eup %2918  ;;  %2930 = vtanh.f32 %v1550_v38  ;;  %v1883_v33 = vsub.f32 1.0, %v2958_v32  ;;  %v2971_v32 = vld [vmem:[%s3565_s22 + $0x60] sm:$0xff] }
 0x48f   : > { %v2921_v42 = vpop.eup %2920  ;;  %2932 = vtanh.f32 %v1542_v40  ;;  %v1884_v40 = vsub.f32 1.0, %v2960_v39 }
 0x490   : > { %v2923_v44 = vpop.eup %2922 }
 0x491   : > { %v2925_v48 = vpop.eup %2924  ;;  %v2485_v45 = vpop.f32.mrb[68].mxu1  ;;  %v1640_v46 = vpack.c.bf16 %v2923_v44, %v2919_v41  ;;  %v2961_v41 = vld [vmem:[%s3565_s22 + $0x8] sm:$0xff] }
 0x492   : > { %v1563_v47 = vadd.f32 %v2485_v45, %v3750_v4  ;;  %v1554_v49 = vpop.f32.mrb[69].mxu1  ;;  %v1639_v50 = vpack.c.bf16 %v2925_v48, %v2921_v42  ;;  %v1882_v42 = vsub.f32 1.0, %v2961_v41 }
 0x493   : > { %v1555_v63 = vadd.f32 %v3750_v4, %v1554_v49  ;;  %v2486_v51 = vpop.f32.mrb[70].mxu1 }
 0x494   : > { %2934 = vtanh.f32 %v1563_v47  ;;  %v1566_v53 = vadd.f32 %v2486_v51, %v3750_v4  ;;  %v1557_v54 = vpop.f32.mrb[71].mxu1  ;;  %2523 = vmatprep.mubr.bf16.mxu0 %v1639_v50 }
 0x495   : > { %2936 = vtanh.f32 %v1555_v63  ;;  %v1558_v55 = vadd.f32 %v3750_v4, %v1557_v54  ;;  %2524 = vmatmul.mubr.bf16.gmra.mrb[60].mxu0 %v1640_v46 }
 0x496   : > { %v2927_v56 = vpop.eup %2926  ;;  %2938 = vtanh.f32 %v1566_v53  ;;  %v2962_v53 = vld [vmem:[%s3565_s22 + $0x30] sm:$0xff] }
 0x497   : > { %v2929_v58 = vpop.eup %2928  ;;  %2940 = vtanh.f32 %v1558_v55  ;;  %v1887_v54 = vsub.f32 1.0, %v2962_v53 }
 0x498   : > { %v2931_v59 = vpop.eup %2930 }
 0x499   : > { %v2933_v43 = vpop.eup %2932  ;;  %v2489_v52 = vpop.f32.mrb[72].mxu1  ;;  %v1642_v57 = vpack.c.bf16 %v2931_v59, %v2927_v56  ;;  %v2963_v56 = vld [vmem:[%s3565_s22 + $0x20] sm:$0xff] }
 0x49a   : > { %v1579_v60 = vadd.f32 %v2489_v52, %v3750_v4  ;;  %v1570_v61 = vpop.f32.mrb[73].mxu1  ;;  %v1641_v62 = vpack.c.bf16 %v2933_v43, %v2929_v58  ;;  %v1885_v58 = vsub.f32 1.0, %v2963_v56  ;;  %v2964_v52 = vld [vmem:[%s3565_s22 + $0x38] sm:$0xff] }
 0x49b   : > { %v1571_v0 = vadd.f32 %v3750_v4, %v1570_v61  ;;  %v2490_v1 = vpop.f32.mrb[74].mxu1 }
 0x49c   : > { %2942 = vtanh.f32 %v1579_v60  ;;  %v1582_v2 = vadd.f32 %v2490_v1, %v3750_v4  ;;  %v1573_v3 = vpop.f32.mrb[75].mxu1  ;;  %2527 = vmatprep.mubr.bf16.mxu0 %v1641_v62  ;;  %v2965_v62 = vld [vmem:[%s3565_s22 + $0x28] sm:$0xff] }
 0x49d   : > { %2944 = vtanh.f32 %v1571_v0  ;;  %v1574_v5 = vadd.f32 %v3750_v4, %v1573_v3  ;;  %2528 = vmatmul.mubr.bf16.gmra.mrb[64].mxu0 %v1642_v57  ;;  %v1888_v57 = vsub.f32 1.0, %v2964_v52  ;;  %v1886_v0 = vsub.f32 1.0, %v2965_v62 }
 0x49e   : > { %v2935_v6 = vpop.eup %2934  ;;  %2946 = vtanh.f32 %v1582_v2 }
 0x49f   : > { %v2937_v7 = vpop.eup %2936  ;;  %2948 = vtanh.f32 %v1574_v5 }
 0x4a0   : > { %v2939_v8 = vpop.eup %2938 }
 0x4a1   : > { %v2941_v9 = vpop.eup %2940  ;;  %v2493_v10 = vpop.f32.mrb[76].mxu1  ;;  %v1644_v11 = vpack.c.bf16 %v2939_v8, %v2935_v6 }
 0x4a2   : > { %v1595_v12 = vadd.f32 %v2493_v10, %v3750_v4  ;;  %v1586_v13 = vpop.f32.mrb[77].mxu1  ;;  %v1643_v14 = vpack.c.bf16 %v2941_v9, %v2937_v7  ;;  %v2966_v9 = vld [vmem:[%s3565_s22 + $0x50] sm:$0xff] }
 0x4a3   : > { %v1587_v15 = vadd.f32 %v3750_v4, %v1586_v13  ;;  %v2494_v16 = vpop.f32.mrb[78].mxu1  ;;  %v1891_v10 = vsub.f32 1.0, %v2966_v9  ;;  %v2979_v9 = vld [vmem:[%s3565_s22 + $0xa0] sm:$0xff] }
 0x4a4   : > { %2950 = vtanh.f32 %v1595_v12  ;;  %v1598_v17 = vadd.f32 %v2494_v16, %v3750_v4  ;;  %v1589_v18 = vpop.f32.mrb[79].mxu1  ;;  %2531 = vmatprep.mubr.bf16.mxu0 %v1643_v14  ;;  %v2967_v12 = vld [vmem:[%s3565_s22 + $0x40] sm:$0xff]  ;;  %v2968_v16 = vld [vmem:[%s3565_s22 + $0x58] sm:$0xff] }
 0x4a5   : > { %2952 = vtanh.f32 %v1587_v15  ;;  %v1590_v19 = vadd.f32 %v3750_v4, %v1589_v18  ;;  %2532 = vmatmul.mubr.bf16.gmra.mrb[68].mxu0 %v1644_v11  ;;  %v1889_v13 = vsub.f32 1.0, %v2967_v12 }
 0x4a6   : > { %v2943_v20 = vpop.eup %2942  ;;  %2954 = vtanh.f32 %v1598_v17  ;;  %v1892_v17 = vsub.f32 1.0, %v2968_v16 }
 0x4a7   : > { %v2945_v21 = vpop.eup %2944  ;;  %2956 = vtanh.f32 %v1590_v19 }
 0x4a8   : > { %v2947_v22 = vpop.eup %2946 }
 0x4a9   : > { %v2949_v23 = vpop.eup %2948  ;;  %v1646_v24 = vpack.c.bf16 %v2947_v22, %v2943_v20  ;;  %v2969_v20 = vld [vmem:[%s3565_s22 + $0x48] sm:$0xff] }
 0x4aa   : > { %v1645_v25 = vpack.c.bf16 %v2949_v23, %v2945_v21  ;;  %v1890_v21 = vsub.f32 1.0, %v2969_v20 }
 0x4ac   : > { %2535 = vmatprep.mubr.bf16.mxu0 %v1645_v25 }
 0x4ad   : > { %2536 = vmatmul.mubr.bf16.gmra.mrb[72].mxu0 %v1646_v24 }
 0x4ae   : > { %v2951_v26 = vpop.eup %2950 }
 0x4af   : > { %v2953_v27 = vpop.eup %2952 }
 0x4b0   : > { %v2955_v28 = vpop.eup %2954 }
 0x4b1   : > { %v2957_v29 = vpop.eup %2956  ;;  %v1648_v4 = vpack.c.bf16 %v2955_v28, %v2951_v26 }
 0x4b2   : > { %v1647_v30 = vpack.c.bf16 %v2957_v29, %v2953_v27  ;;  %v2970_v29 = vld [vmem:[%s3565_s22 + $0x70] sm:$0xff] }
 0x4b4   : > { %2539 = vmatprep.mubr.bf16.mxu0 %v1647_v30 }
 0x4b5   : > { %2540 = vmatmul.mubr.bf16.gmra.mrb[76].mxu0 %v1648_v4  ;;  %v1895_v4 = vsub.f32 1.0, %v2970_v29  ;;  %v2983_v29 = vld [vmem:[%s3565_s22 + $0xc0] sm:$0xff] }
 0x54e   : > { %v2513_v36 = vpop.f32.mrb[48].mxu0 }
 0x54f   : > { %v1763_v37 = vadd.f32 %v2513_v36, %v3787_v31  ;;  %v1754_v38 = vpop.f32.mrb[49].mxu0  ;;  %v2972_v36 = vld [vmem:[%s3565_s22 + $0x78] sm:$0xff] }
 0x550   : > { %v1755_v44 = vadd.f32 %v3787_v31, %v1754_v38  ;;  %v2514_v48 = vpop.f32.mrb[50].mxu0 }
 0x551   : > { %v1915_v45 = vmul.f32 %v1883_v33, %v1763_v37  ;;  %v1766_v46 = vadd.f32 %v2514_v48, %v3787_v31  ;;  %v1757_v47 = vpop.f32.mrb[51].mxu0  ;;  %v1893_v33 = vsub.f32 1.0, %v2971_v32  ;;  %v1896_v37 = vsub.f32 1.0, %v2972_v36 }
 0x552   : > { %v1913_v49 = vmul.f32 %v1881_v35, %v1755_v44  ;;  %v1758_v50 = vadd.f32 %v3787_v31, %v1757_v47 }
 0x553   : > { %1947 = vst [vmem:[%s3799_s13 + $0x10] sm:$0xff] %v1915_v45  ;;  %v1916_v63 = vmul.f32 %v1884_v40, %v1766_v46  ;;  %v2973_v40 = vld [vmem:[%s3565_s22 + $0x68] sm:$0xff] }
 0x554   : > { %1945 = vst [vmem:[%s3799_s13] sm:$0xff] %v1913_v49  ;;  %v1914_v51 = vmul.f32 %v1882_v42, %v1758_v50  ;;  %v1894_v41 = vsub.f32 1.0, %v2973_v40  ;;  %v2974_v50 = vld [vmem:[%s3565_s22 + $0x90] sm:$0xff] }
 0x555   : > { %1948 = vst [vmem:[%s3799_s13 + $0x18] sm:$0xff] %v1916_v63  ;;  %v1899_v63 = vsub.f32 1.0, %v2974_v50  ;;  %v2987_v50 = vld [vmem:[%s3565_s22 + $0xe0] sm:$0xff] }
 0x556   : > { %1946 = vst [vmem:[%s3799_s13 + $0x8] sm:$0xff] %v1914_v51  ;;  %v2975_v51 = vld [vmem:[%s3565_s22 + $0x80] sm:$0xff] }
 0x557   : > { %v2517_v55 = vpop.f32.mrb[52].mxu0  ;;  %v1897_v53 = vsub.f32 1.0, %v2975_v51 }
 0x558   : > { %v1779_v59 = vadd.f32 %v2517_v55, %v3787_v31  ;;  %v1770_v43 = vpop.f32.mrb[53].mxu0 }
 0x559   : > { %v1771_v60 = vadd.f32 %v3787_v31, %v1770_v43  ;;  %v2518_v61 = vpop.f32.mrb[54].mxu0  ;;  %v2977_v43 = vld [vmem:[%s3565_s22 + $0x88] sm:$0xff] }
 0x55a   : > { %v1919_v1 = vmul.f32 %v1887_v54, %v1779_v59  ;;  %v1782_v2 = vadd.f32 %v2518_v61, %v3787_v31  ;;  %v1773_v3 = vpop.f32.mrb[55].mxu0  ;;  %v1898_v52 = vsub.f32 1.0, %v2977_v43 }
 0x55b   : > { %v1917_v5 = vmul.f32 %v1885_v58, %v1771_v60  ;;  %v1774_v6 = vadd.f32 %v3787_v31, %v1773_v3  ;;  %v2976_v58 = vld [vmem:[%s3565_s22 + $0x98] sm:$0xff] }
 0x55c   : > { %1951 = vst [vmem:[%s3799_s13 + $0x30] sm:$0xff] %v1919_v1  ;;  %v1920_v7 = vmul.f32 %v1888_v57, %v1782_v2  ;;  %v1900_v59 = vsub.f32 1.0, %v2976_v58 }
 0x55d   : > { %1949 = vst [vmem:[%s3799_s13 + $0x20] sm:$0xff] %v1917_v5  ;;  %v1918_v8 = vmul.f32 %v1886_v0, %v1774_v6  ;;  %v2978_v6 = vld [vmem:[%s3565_s22 + $0xb0] sm:$0xff] }
 0x55e   : > { %1952 = vst [vmem:[%s3799_s13 + $0x38] sm:$0xff] %v1920_v7  ;;  %v1903_v7 = vsub.f32 1.0, %v2978_v6 }
 0x55f   : > { %1950 = vst [vmem:[%s3799_s13 + $0x28] sm:$0xff] %v1918_v8 }
 0x560   : > { %v2521_v11 = vpop.f32.mrb[56].mxu0 }
 0x561   : > { %v1795_v14 = vadd.f32 %v2521_v11, %v3787_v31  ;;  %v1786_v15 = vpop.f32.mrb[57].mxu0 }
 0x562   : > { %v1787_v18 = vadd.f32 %v3787_v31, %v1786_v15  ;;  %v2522_v19 = vpop.f32.mrb[58].mxu0 }
 0x563   : > { %v1923_v22 = vmul.f32 %v1891_v10, %v1795_v14  ;;  %v1798_v23 = vadd.f32 %v2522_v19, %v3787_v31  ;;  %v1789_v24 = vpop.f32.mrb[59].mxu0  ;;  %v1901_v10 = vsub.f32 1.0, %v2979_v9 }
 0x564   : > { %v1921_v25 = vmul.f32 %v1889_v13, %v1787_v18  ;;  %v1790_v26 = vadd.f32 %v3787_v31, %v1789_v24  ;;  %v2980_v13 = vld [vmem:[%s3565_s22 + $0xb8] sm:$0xff] }
 0x565   : > { %1955 = vst [vmem:[%s3799_s13 + $0x50] sm:$0xff] %v1923_v22  ;;  %v1924_v27 = vmul.f32 %v1892_v17, %v1798_v23  ;;  %v1904_v14 = vsub.f32 1.0, %v2980_v13  ;;  %v2981_v17 = vld [vmem:[%s3565_s22 + $0xa8] sm:$0xff] }
 0x566   : > { %1953 = vst [vmem:[%s3799_s13 + $0x40] sm:$0xff] %v1921_v25  ;;  %v1922_v28 = vmul.f32 %v1890_v21, %v1790_v26  ;;  %v1902_v18 = vsub.f32 1.0, %v2981_v17  ;;  %v2982_v26 = vld [vmem:[%s3565_s22 + $0xd0] sm:$0xff] }
 0x567   : > { %1956 = vst [vmem:[%s3799_s13 + $0x58] sm:$0xff] %v1924_v27  ;;  %v1907_v27 = vsub.f32 1.0, %v2982_v26 }
 0x568   : > { %1954 = vst [vmem:[%s3799_s13 + $0x48] sm:$0xff] %v1922_v28  ;;  %v2525_v30 = vpop.f32.mrb[60].mxu0 }
 0x569   : > { %v1811_v34 = vadd.f32 %v2525_v30, %v3787_v31  ;;  %v1802_v35 = vpop.f32.mrb[61].mxu0 }
 0x56a   : > { %v1803_v38 = vadd.f32 %v3787_v31, %v1802_v35  ;;  %v2526_v39 = vpop.f32.mrb[62].mxu0 }
 0x56b   : > { %v1927_v42 = vmul.f32 %v1895_v4, %v1811_v34  ;;  %v1814_v44 = vadd.f32 %v2526_v39, %v3787_v31  ;;  %v1805_v48 = vpop.f32.mrb[63].mxu0  ;;  %v1905_v4 = vsub.f32 1.0, %v2983_v29 }
 0x56c   : > { %v1925_v45 = vmul.f32 %v1893_v33, %v1803_v38  ;;  %v1806_v46 = vadd.f32 %v3787_v31, %v1805_v48  ;;  %v2984_v33 = vld [vmem:[%s3565_s22 + $0xd8] sm:$0xff] }
 0x56d   : > { %1959 = vst [vmem:[%s3799_s13 + $0x70] sm:$0xff] %v1927_v42  ;;  %v1928_v47 = vmul.f32 %v1896_v37, %v1814_v44  ;;  %v1908_v34 = vsub.f32 1.0, %v2984_v33  ;;  %v2985_v37 = vld [vmem:[%s3565_s22 + $0xc8] sm:$0xff] }
 0x56e   : > { %1957 = vst [vmem:[%s3799_s13 + $0x60] sm:$0xff] %v1925_v45  ;;  %v1926_v49 = vmul.f32 %v1894_v41, %v1806_v46  ;;  %v1906_v38 = vsub.f32 1.0, %v2985_v37  ;;  %v2986_v46 = vld [vmem:[%s3565_s22 + $0xf0] sm:$0xff] }
 0x56f   : > { %1960 = vst [vmem:[%s3799_s13 + $0x78] sm:$0xff] %v1928_v47  ;;  %v1911_v47 = vsub.f32 1.0, %v2986_v46 }
 0x570   : > { %1958 = vst [vmem:[%s3799_s13 + $0x68] sm:$0xff] %v1926_v49  ;;  %v2529_v54 = vpop.f32.mrb[64].mxu0 }
 0x571   : > { %v1827_v55 = vadd.f32 %v2529_v54, %v3787_v31  ;;  %v1818_v56 = vpop.f32.mrb[65].mxu0  ;;  %v2988_v54 = vld [vmem:[%s3565_s22 + $0xf8] sm:$0xff] }
 0x572   : > { %v1819_v57 = vadd.f32 %v3787_v31, %v1818_v56  ;;  %v2530_v60 = vpop.f32.mrb[66].mxu0 }
 0x573   : > { %v1931_v61 = vmul.f32 %v1899_v63, %v1827_v55  ;;  %v1830_v62 = vadd.f32 %v2530_v60, %v3787_v31  ;;  %v1821_v0 = vpop.f32.mrb[67].mxu0  ;;  %v1909_v63 = vsub.f32 1.0, %v2987_v50  ;;  %v1912_v55 = vsub.f32 1.0, %v2988_v54 }
 0x574   : > { %v1929_v1 = vmul.f32 %v1897_v53, %v1819_v57  ;;  %v1822_v2 = vadd.f32 %v3787_v31, %v1821_v0 }
 0x575   : > { %1963 = vst [vmem:[%s3799_s13 + $0x90] sm:$0xff] %v1931_v61  ;;  %v1932_v3 = vmul.f32 %v1900_v59, %v1830_v62  ;;  %v2989_v59 = vld [vmem:[%s3565_s22 + $0xe8] sm:$0xff]  ;;  %s3160_s22 = scalar_lea.vmem %s3893_s26, 4096 }
 0x576   : > { %1961 = vst [vmem:[%s3799_s13 + $0x80] sm:$0xff] %v1929_v1  ;;  %v1930_v5 = vmul.f32 %v1898_v52, %v1822_v2  ;;  %v1910_v43 = vsub.f32 1.0, %v2989_v59  ;;  %p3161_p7 = scmp.ne.s32.totalorder %s3893_s26, %s3160_s22  ;;  %p3168_p0 = scmp.lt.s32.totalorder %s3166_s21, %s3160_s22 }
 0x577   : > { %1964 = vst [vmem:[%s3799_s13 + $0x98] sm:$0xff] %v1932_v3 }
 0x578   : > { %1962 = vst [vmem:[%s3799_s13 + $0x88] sm:$0xff] %v1930_v5  ;;  %v2533_v8 = vpop.f32.mrb[68].mxu0  ;;  %p3162_p12 = pnand %p3161_p7, %p3979_p4  ;;  %p3169_p2 = por %p3168_p0, %p3167_p13 }
 0x579   : > { %v1843_v11 = vadd.f32 %v2533_v8, %v3787_v31  ;;  %v1834_v12 = vpop.f32.mrb[69].mxu0 }
 0x57a   : > { %v1835_v15 = vadd.f32 %v3787_v31, %v1834_v12  ;;  %v2534_v16 = vpop.f32.mrb[70].mxu0  ;;  %p3163_p1 = pneg %p3162_p12 }
 0x57b   : > { %v1935_v19 = vmul.f32 %v1903_v7, %v1843_v11  ;;  %v1846_v20 = vadd.f32 %v2534_v16, %v3787_v31  ;;  %v1837_v21 = vpop.f32.mrb[71].mxu0 }
 0x57c   : > { %v1933_v22 = vmul.f32 %v1901_v10, %v1835_v15  ;;  %v1838_v23 = vadd.f32 %v3787_v31, %v1837_v21  ;;  %p3170_p8 = pnand %p3169_p2, %p3163_p1 }
 0x57d   : > { %1967 = vst [vmem:[%s3799_s13 + $0xb0] sm:$0xff] %v1935_v19  ;;  %v1936_v24 = vmul.f32 %v1904_v14, %v1846_v20 }
 0x57e   : > { %1965 = vst [vmem:[%s3799_s13 + $0xa0] sm:$0xff] %v1933_v22  ;;  %v1934_v25 = vmul.f32 %v1902_v18, %v1838_v23 }
 0x57f   : > { %1968 = vst [vmem:[%s3799_s13 + $0xb8] sm:$0xff] %v1936_v24 }
 0x580   : > { %1966 = vst [vmem:[%s3799_s13 + $0xa8] sm:$0xff] %v1934_v25  ;;  %v2537_v28 = vpop.f32.mrb[72].mxu0 }
 0x581   : > { %v1859_v30 = vadd.f32 %v2537_v28, %v3787_v31  ;;  %v1850_v32 = vpop.f32.mrb[73].mxu0 }
 0x582   : > { %v1851_v35 = vadd.f32 %v3787_v31, %v1850_v32  ;;  %v2538_v36 = vpop.f32.mrb[74].mxu0 }
 0x583   : > { %v1939_v39 = vmul.f32 %v1907_v27, %v1859_v30  ;;  %v1862_v40 = vadd.f32 %v2538_v36, %v3787_v31  ;;  %v1853_v41 = vpop.f32.mrb[75].mxu0 }
 0x584   : > { %v1937_v42 = vmul.f32 %v1905_v4, %v1851_v35  ;;  %v1854_v44 = vadd.f32 %v3787_v31, %v1853_v41 }
 0x585   : > { %1971 = vst [vmem:[%s3799_s13 + $0xd0] sm:$0xff] %v1939_v39  ;;  %v1940_v48 = vmul.f32 %v1908_v34, %v1862_v40 }
 0x586   : > { %1969 = vst [vmem:[%s3799_s13 + $0xc0] sm:$0xff] %v1937_v42  ;;  %v1938_v45 = vmul.f32 %v1906_v38, %v1854_v44 }
 0x587   : > { %1972 = vst [vmem:[%s3799_s13 + $0xd8] sm:$0xff] %v1940_v48 }
 0x588   : > { %1970 = vst [vmem:[%s3799_s13 + $0xc8] sm:$0xff] %v1938_v45  ;;  %v2541_v49 = vpop.f32.mrb[76].mxu0 }
 0x589   : > { %v1875_v51 = vadd.f32 %v2541_v49, %v3787_v31  ;;  %v1866_v53 = vpop.f32.mrb[77].mxu0 }
 0x58a   : > { %v1867_v56 = vadd.f32 %v3787_v31, %v1866_v53  ;;  %v2542_v58 = vpop.f32.mrb[78].mxu0 }
 0x58b   : > { %v1943_v52 = vmul.f32 %v1911_v47, %v1875_v51  ;;  %v1878_v57 = vadd.f32 %v2542_v58, %v3787_v31  ;;  %v1869_v60 = vpop.f32.mrb[79].mxu0 }
 0x58c   : > { %v1941_v61 = vmul.f32 %v1909_v63, %v1867_v56  ;;  %v1870_v62 = vadd.f32 %v3787_v31, %v1869_v60 }
 0x58d   : > { %1975 = vst [vmem:[%s3799_s13 + $0xf0] sm:$0xff] %v1943_v52  ;;  %v1944_v0 = vmul.f32 %v1912_v55, %v1878_v57 }
 0x58e   : > { %1973 = vst [vmem:[%s3799_s13 + $0xe0] sm:$0xff] %v1941_v61  ;;  %v1942_v1 = vmul.f32 %v1910_v43, %v1870_v62 }
 0x58f   : > { %1976 = vst [vmem:[%s3799_s13 + $0xf8] sm:$0xff] %v1944_v0 }
 0x590   : > { %1974 = vst [vmem:[%s3799_s13 + $0xe8] sm:$0xff] %v1942_v1 }
 0x591   : > { %3173 = shalt.err (!%p3170_p8)
}
 0x592   : > { %s3174_s12 = scalar_lea.hbm %s3891_s8, 4096  ;;  %s3178_s28 = scalar_lea.hbm %s3978_s27, 8192 }
 0x593   : > { %p3175_p6 = scmp.ne.s32.totalorder %s3891_s8, %s3174_s12  ;;  %p3179_p3 = scmp.lt.u32.totalorder %s3891_s8, %s3978_s27 }
 0x594   : > { %p3180_p5 = scmp.lt.u32.totalorder %s3178_s28, %s3174_s12  ;;  %p3182_p7 = scmp.lt.u32.totalorder %s3174_s12, %s3891_s8 }
 0x595   : > { %p3176_p10 = pnand %p3175_p6, %p3979_p4 }
 0x596   : > { %p3181_p9 = por %p3180_p5, %p3179_p3 }
 0x597   : > { %p3177_p11 = pneg %p3176_p10 }
 0x598   : > { %p3183_p12 = por %p3182_p7, %p3181_p9 }
 0x59a   : > { %p3184_p1 = pnand %p3183_p12, %p3177_p11 }
 0x59c   : > { %3187 = shalt.err (!%p3184_p1)
}
 0x59d   : > { %s3251_s22 = smov 128   ;;  %s3252_s15 = smov 8  }
 0x59e   : > { %2581 = dma.vmem_to_hbm [thread:$0]  (%p3979_p4), %s3893_s26, 4096, %s3891_s8, %s1978_s23, %s3251_s22, %s3251_s22, %s3252_s15  }
 0x59f PF: > { %s2006_s1 = sand.u32 1, %s3226_s17   ;;  %p3980_p13 = scmp.ne.s32.totalorder %s3967_s14, 0 }
 0x5a0   : > { %p3981_p0 = scmp.ge.s32.totalorder %s3238_s20, 2  ;;  %s2007_s21 = scalar_lea.sflag [#allocation4], %s2006_s1 }
 0x5a2   : > { %p2604_p2 = pnand %p3981_p0, %p3980_p13 }
 0x5a4   : > { %3221 = dma.done.wait (!%p2604_p2), %s2007_s21, 4096  }
 0x5a5   : > { %3223 = vsyncadd (!%p2604_p2), %s2007_s21, 4294963200  ;;  %p27_p8 = scmp.ge.s32.totalorder %s3486_s16, 4   ;;  %s3982_s17 = smov %s3230_s18 }
 0x5a6   : > { %s3983_s18 = smov %s3234_s19  ;;  %s3984_s19 = smov %s3498_s10 }
 0x5a7   : > { %s3985_s20 = smov %s3486_s16  ;;  %29 = sbr.rel (!%p27_p8) target bundleno = 13 (0xd), region = 129 }
 0x5ae   :  { %2012 = vsyncpa [#allocation3], 1 }
 0x5af   :  { %2014 = vsyncpa [#allocation3 + $0x1], 1 }
 0x5b0   :  { %2015 = vsyncpa [#allocation6], 1 }
 0x5b1   :  { %2016 = vsyncpa [#allocation9], 1 }
 0x5b2   :  { %2017 = vsyncpa [#allocation12], 1 }
 0x5b3   :  { %2018 = vsyncpa [#allocation4], 1 }
 0x5b4   :  { %2020 = vsyncpa [#allocation4 + $0x1], 1 }

</bundles_post_ra>
